<compile_context>
chip_gen: v7x
topology: tpu7x:2x2x1
jax: 0.10.0
libtpu: 0.0.40
codegen_flags: <defaults>
</compile_context>

<pallas_src>
import jax
import jax.numpy as jnp
from jax.experimental import pallas as pl
from jax.experimental.pallas import tpu as pltpu

EPS = 1e-3  # BatchNorm2d eps=0.001


def dwconv_bn_kernel(x0_ref, x1_ref, x2_ref, w_ref, gamma_ref, beta_ref, out_ref):
    """Fused depthwise 3x3 conv + training-mode batchnorm for one channel block.

    x{0,1,2}_ref: (N, H+2, W, Cb)  zero-padded (in H) input, width-shifted by kw=0,1,2
    w_ref:        (3, 3, Cb)       depthwise weights, one 3x3 tap per channel
    gamma_ref:    (1, Cb)
    beta_ref:     (1, Cb)
    out_ref:      (N, H, W, Cb)
    """
    N, Hp, W, Cb = x0_ref.shape
    H = Hp - 2

    w = w_ref[...].astype(jnp.float32)

    # Depthwise 3x3 conv as 9 shifted multiply-accumulates (pure VPU work,
    # channels stay on the lane axis, only cheap H-axis slices).
    acc = None
    for kw, xr in enumerate((x0_ref, x1_ref, x2_ref)):
        x = xr[...].astype(jnp.float32)
        for kh in range(3):
            tap = x[:, kh:kh + H, :, :] * w[kh, kw, :]
            acc = tap if acc is None else acc + tap

    # BatchNorm2d (training mode): per-channel mean / biased variance over (N, H, W).
    cnt = jnp.float32(N * H * W)
    mean = jnp.sum(acc, axis=(0, 1, 2), keepdims=True) / cnt
    diff = acc - mean
    var = jnp.sum(diff * diff, axis=(0, 1, 2), keepdims=True) / cnt
    inv = jax.lax.rsqrt(var + EPS)

    g = gamma_ref[...].astype(jnp.float32).reshape(1, 1, 1, Cb)
    b = beta_ref[...].astype(jnp.float32).reshape(1, 1, 1, Cb)
    out_ref[...] = (diff * inv * g + b).astype(out_ref.dtype)


def _pick_channel_block(c_padded):
    # Largest multiple-of-128 block <= 640 that divides the padded channel count.
    for cb in (640, 512, 384, 256, 128):
        if c_padded % cb == 0:
            return cb
    return c_padded


def dwconv_bn(x_nchw, weight_oihw, gamma, beta):
    """x_nchw: (N, C, H, W); weight_oihw: (C, 1, 3, 3) depthwise; gamma/beta: (C,)."""
    N, C, H, W = x_nchw.shape
    Cp = ((C + 127) // 128) * 128           # pad channels to a multiple of 128
    pad_c = Cp - C
    Cb = _pick_channel_block(Cp)
    Hp = H + 2

    # NCHW -> NHWC, zero-pad spatial dims by 1 (conv padding), pad channels.
    x_nhwc = jnp.transpose(x_nchw, (0, 2, 3, 1))
    x_pad = jnp.pad(x_nhwc, ((0, 0), (1, 1), (1, 1), (0, pad_c)))

    # Three width-shifted copies so the kernel never slices the sublane (W) axis.
    x0 = x_pad[:, :, 0:W, :]
    x1 = x_pad[:, :, 1:W + 1, :]
    x2 = x_pad[:, :, 2:W + 2, :]

    # (C, 1, 3, 3) -> (3, 3, Cp); pad extra channels with zero weights.
    w = jnp.transpose(weight_oihw[:, 0, :, :], (1, 2, 0))
    w = jnp.pad(w, ((0, 0), (0, 0), (0, pad_c)))
    g = jnp.pad(gamma, (0, pad_c), constant_values=1.0).reshape(1, Cp)
    b = jnp.pad(beta, (0, pad_c)).reshape(1, Cp)

    out_nhwc = pl.pallas_call(
        dwconv_bn_kernel,
        out_shape=jax.ShapeDtypeStruct((N, H, W, Cp), x_nchw.dtype),
        grid=(Cp // Cb,),
        in_specs=[
            pl.BlockSpec((N, Hp, W, Cb), lambda c: (0, 0, 0, c)),  # x shifted kw=0
            pl.BlockSpec((N, Hp, W, Cb), lambda c: (0, 0, 0, c)),  # x shifted kw=1
            pl.BlockSpec((N, Hp, W, Cb), lambda c: (0, 0, 0, c)),  # x shifted kw=2
            pl.BlockSpec((3, 3, Cb), lambda c: (0, 0, c)),          # depthwise weights
            pl.BlockSpec((1, Cb), lambda c: (0, c)),                # gamma
            pl.BlockSpec((1, Cb), lambda c: (0, c)),                # beta
        ],
        out_specs=pl.BlockSpec((N, H, W, Cb), lambda c: (0, 0, 0, c)),
        compiler_params=pltpu.CompilerParams(dimension_semantics=("parallel",)),
    )(x0, x1, x2, w, g, b)

    # Drop channel padding, NHWC -> NCHW.
    return jnp.transpose(out_nhwc[..., :C], (0, 3, 1, 2))


if __name__ == "__main__":
    # Real module shape: N=1, C=1824 (non-multiple of 128 -> exercises padding),
    # spatial 7x7.
    N, C, H, W = 1, 1824, 7, 7

    key = jax.random.PRNGKey(0)
    kx, kw, kg, kb = jax.random.split(key, 4)

    x = jax.random.normal(kx, (N, C, H, W), dtype=jnp.float32)
    weight = jax.random.normal(kw, (C, 1, 3, 3), dtype=jnp.float32) * 0.1  # depthwise conv weight
    gamma = 1.0 + 0.1 * jax.random.normal(kg, (C,), dtype=jnp.float32)     # BN weight
    beta = 0.1 * jax.random.normal(kb, (C,), dtype=jnp.float32)            # BN bias

    out = dwconv_bn(x, weight, gamma, beta)
    out = jax.block_until_ready(out)

    # Pure-JAX reference (depthwise conv + training-mode batchnorm).
    conv_ref = jax.lax.conv_general_dilated(
        x, weight, window_strides=(1, 1), padding=((1, 1), (1, 1)),
        dimension_numbers=("NCHW", "OIHW", "NCHW"), feature_group_count=C)
    mean = conv_ref.mean(axis=(0, 2, 3), keepdims=True)
    var = ((conv_ref - mean) ** 2).mean(axis=(0, 2, 3), keepdims=True)  # biased
    ref = (conv_ref - mean) / jnp.sqrt(var + EPS)
    ref = ref * gamma.reshape(1, C, 1, 1) + beta.reshape(1, C, 1, 1)

    assert out.shape == (N, C, H, W), out.shape
    err = float(jnp.max(jnp.abs(out - ref)))
    assert jnp.allclose(out, ref, atol=1e-4, rtol=1e-4), err

    print("KERNEL_OK")
</pallas_src>

<mosaic_0001>
module attributes {stable_mosaic.version = 11 : i64} {
  func.func @dwconv_bn_kernel(%arg0: i32, %arg1: memref<1x9x7x640xf32, #tpu.memory_space<vmem>>, %arg2: memref<1x9x7x640xf32, #tpu.memory_space<vmem>>, %arg3: memref<1x9x7x640xf32, #tpu.memory_space<vmem>>, %arg4: memref<3x3x640xf32, #tpu.memory_space<vmem>>, %arg5: memref<1x640xf32, #tpu.memory_space<vmem>>, %arg6: memref<1x640xf32, #tpu.memory_space<vmem>>, %arg7: memref<1x7x7x640xf32, #tpu.memory_space<vmem>>) attributes {dimension_semantics = [#tpu.dimension_semantics<parallel>], iteration_bounds = array<i64: 3>, scalar_prefetch = 0 : i64, scratch_operands = 0 : i64, tpu.core_type = #tpu.core_type<tc>, window_params = [{transform_indices = @transform_0, window_bounds = array<i64: 1, 9, 7, 640>}, {transform_indices = @transform_1, window_bounds = array<i64: 1, 9, 7, 640>}, {transform_indices = @transform_2, window_bounds = array<i64: 1, 9, 7, 640>}, {transform_indices = @transform_3, window_bounds = array<i64: 3, 3, 640>}, {transform_indices = @transform_4, window_bounds = array<i64: 1, 640>}, {transform_indices = @transform_5, window_bounds = array<i64: 1, 640>}, {transform_indices = @transform_6, window_bounds = array<i64: 1, 7, 7, 640>}]} {
    %c0 = arith.constant 0 : index
    %c0_0 = arith.constant 0 : index
    %c0_1 = arith.constant 0 : index
    %0 = vector.load %arg4[%c0, %c0_0, %c0_1] : memref<3x3x640xf32, #tpu.memory_space<vmem>>, vector<3x3x640xf32>
    %c0_2 = arith.constant 0 : index
    %c0_3 = arith.constant 0 : index
    %c0_4 = arith.constant 0 : index
    %c0_5 = arith.constant 0 : index
    %1 = vector.load %arg1[%c0_2, %c0_3, %c0_4, %c0_5] : memref<1x9x7x640xf32, #tpu.memory_space<vmem>>, vector<1x9x7x640xf32>
    %2 = vector.extract_strided_slice %1 {offsets = [0, 0, 0, 0], sizes = [1, 7, 7, 640], strides = [1, 1, 1, 1]} : vector<1x9x7x640xf32> to vector<1x7x7x640xf32>
    %3 = vector.extract_strided_slice %0 {offsets = [0, 0, 0], sizes = [1, 1, 640], strides = [1, 1, 1]} : vector<3x3x640xf32> to vector<1x1x640xf32>
    %4 = vector.shape_cast %3 : vector<1x1x640xf32> to vector<640xf32>
    %5 = vector.shape_cast %4 : vector<640xf32> to vector<1x1x1x640xf32>
    %6 = vector.broadcast %5 : vector<1x1x1x640xf32> to vector<1x7x7x640xf32>
    %7 = arith.mulf %2, %6 : vector<1x7x7x640xf32>
    %8 = vector.extract_strided_slice %1 {offsets = [0, 1, 0, 0], sizes = [1, 7, 7, 640], strides = [1, 1, 1, 1]} : vector<1x9x7x640xf32> to vector<1x7x7x640xf32>
    %9 = vector.extract_strided_slice %0 {offsets = [1, 0, 0], sizes = [1, 1, 640], strides = [1, 1, 1]} : vector<3x3x640xf32> to vector<1x1x640xf32>
    %10 = vector.shape_cast %9 : vector<1x1x640xf32> to vector<640xf32>
    %11 = vector.shape_cast %10 : vector<640xf32> to vector<1x1x1x640xf32>
    %12 = vector.broadcast %11 : vector<1x1x1x640xf32> to vector<1x7x7x640xf32>
    %13 = arith.mulf %8, %12 : vector<1x7x7x640xf32>
    %14 = arith.addf %7, %13 : vector<1x7x7x640xf32>
    %15 = vector.extract_strided_slice %1 {offsets = [0, 2, 0, 0], sizes = [1, 7, 7, 640], strides = [1, 1, 1, 1]} : vector<1x9x7x640xf32> to vector<1x7x7x640xf32>
    %16 = vector.extract_strided_slice %0 {offsets = [2, 0, 0], sizes = [1, 1, 640], strides = [1, 1, 1]} : vector<3x3x640xf32> to vector<1x1x640xf32>
    %17 = vector.shape_cast %16 : vector<1x1x640xf32> to vector<640xf32>
    %18 = vector.shape_cast %17 : vector<640xf32> to vector<1x1x1x640xf32>
    %19 = vector.broadcast %18 : vector<1x1x1x640xf32> to vector<1x7x7x640xf32>
    %20 = arith.mulf %15, %19 : vector<1x7x7x640xf32>
    %21 = arith.addf %14, %20 : vector<1x7x7x640xf32>
    %c0_6 = arith.constant 0 : index
    %c0_7 = arith.constant 0 : index
    %c0_8 = arith.constant 0 : index
    %c0_9 = arith.constant 0 : index
    %22 = vector.load %arg2[%c0_6, %c0_7, %c0_8, %c0_9] : memref<1x9x7x640xf32, #tpu.memory_space<vmem>>, vector<1x9x7x640xf32>
    %23 = vector.extract_strided_slice %22 {offsets = [0, 0, 0, 0], sizes = [1, 7, 7, 640], strides = [1, 1, 1, 1]} : vector<1x9x7x640xf32> to vector<1x7x7x640xf32>
    %24 = vector.extract_strided_slice %0 {offsets = [0, 1, 0], sizes = [1, 1, 640], strides = [1, 1, 1]} : vector<3x3x640xf32> to vector<1x1x640xf32>
    %25 = vector.shape_cast %24 : vector<1x1x640xf32> to vector<640xf32>
    %26 = vector.shape_cast %25 : vector<640xf32> to vector<1x1x1x640xf32>
    %27 = vector.broadcast %26 : vector<1x1x1x640xf32> to vector<1x7x7x640xf32>
    %28 = arith.mulf %23, %27 : vector<1x7x7x640xf32>
    %29 = arith.addf %21, %28 : vector<1x7x7x640xf32>
    %30 = vector.extract_strided_slice %22 {offsets = [0, 1, 0, 0], sizes = [1, 7, 7, 640], strides = [1, 1, 1, 1]} : vector<1x9x7x640xf32> to vector<1x7x7x640xf32>
    %31 = vector.extract_strided_slice %0 {offsets = [1, 1, 0], sizes = [1, 1, 640], strides = [1, 1, 1]} : vector<3x3x640xf32> to vector<1x1x640xf32>
    %32 = vector.shape_cast %31 : vector<1x1x640xf32> to vector<640xf32>
    %33 = vector.shape_cast %32 : vector<640xf32> to vector<1x1x1x640xf32>
    %34 = vector.broadcast %33 : vector<1x1x1x640xf32> to vector<1x7x7x640xf32>
    %35 = arith.mulf %30, %34 : vector<1x7x7x640xf32>
    %36 = arith.addf %29, %35 : vector<1x7x7x640xf32>
    %37 = vector.extract_strided_slice %22 {offsets = [0, 2, 0, 0], sizes = [1, 7, 7, 640], strides = [1, 1, 1, 1]} : vector<1x9x7x640xf32> to vector<1x7x7x640xf32>
    %38 = vector.extract_strided_slice %0 {offsets = [2, 1, 0], sizes = [1, 1, 640], strides = [1, 1, 1]} : vector<3x3x640xf32> to vector<1x1x640xf32>
    %39 = vector.shape_cast %38 : vector<1x1x640xf32> to vector<640xf32>
    %40 = vector.shape_cast %39 : vector<640xf32> to vector<1x1x1x640xf32>
    %41 = vector.broadcast %40 : vector<1x1x1x640xf32> to vector<1x7x7x640xf32>
    %42 = arith.mulf %37, %41 : vector<1x7x7x640xf32>
    %43 = arith.addf %36, %42 : vector<1x7x7x640xf32>
    %c0_10 = arith.constant 0 : index
    %c0_11 = arith.constant 0 : index
    %c0_12 = arith.constant 0 : index
    %c0_13 = arith.constant 0 : index
    %44 = vector.load %arg3[%c0_10, %c0_11, %c0_12, %c0_13] : memref<1x9x7x640xf32, #tpu.memory_space<vmem>>, vector<1x9x7x640xf32>
    %45 = vector.extract_strided_slice %44 {offsets = [0, 0, 0, 0], sizes = [1, 7, 7, 640], strides = [1, 1, 1, 1]} : vector<1x9x7x640xf32> to vector<1x7x7x640xf32>
    %46 = vector.extract_strided_slice %0 {offsets = [0, 2, 0], sizes = [1, 1, 640], strides = [1, 1, 1]} : vector<3x3x640xf32> to vector<1x1x640xf32>
    %47 = vector.shape_cast %46 : vector<1x1x640xf32> to vector<640xf32>
    %48 = vector.shape_cast %47 : vector<640xf32> to vector<1x1x1x640xf32>
    %49 = vector.broadcast %48 : vector<1x1x1x640xf32> to vector<1x7x7x640xf32>
    %50 = arith.mulf %45, %49 : vector<1x7x7x640xf32>
    %51 = arith.addf %43, %50 : vector<1x7x7x640xf32>
    %52 = vector.extract_strided_slice %44 {offsets = [0, 1, 0, 0], sizes = [1, 7, 7, 640], strides = [1, 1, 1, 1]} : vector<1x9x7x640xf32> to vector<1x7x7x640xf32>
    %53 = vector.extract_strided_slice %0 {offsets = [1, 2, 0], sizes = [1, 1, 640], strides = [1, 1, 1]} : vector<3x3x640xf32> to vector<1x1x640xf32>
    %54 = vector.shape_cast %53 : vector<1x1x640xf32> to vector<640xf32>
    %55 = vector.shape_cast %54 : vector<640xf32> to vector<1x1x1x640xf32>
    %56 = vector.broadcast %55 : vector<1x1x1x640xf32> to vector<1x7x7x640xf32>
    %57 = arith.mulf %52, %56 : vector<1x7x7x640xf32>
    %58 = arith.addf %51, %57 : vector<1x7x7x640xf32>
    %59 = vector.extract_strided_slice %44 {offsets = [0, 2, 0, 0], sizes = [1, 7, 7, 640], strides = [1, 1, 1, 1]} : vector<1x9x7x640xf32> to vector<1x7x7x640xf32>
    %60 = vector.extract_strided_slice %0 {offsets = [2, 2, 0], sizes = [1, 1, 640], strides = [1, 1, 1]} : vector<3x3x640xf32> to vector<1x1x640xf32>
    %61 = vector.shape_cast %60 : vector<1x1x640xf32> to vector<640xf32>
    %62 = vector.shape_cast %61 : vector<640xf32> to vector<1x1x1x640xf32>
    %63 = vector.broadcast %62 : vector<1x1x1x640xf32> to vector<1x7x7x640xf32>
    %64 = arith.mulf %59, %63 : vector<1x7x7x640xf32>
    %65 = arith.addf %58, %64 : vector<1x7x7x640xf32>
    %cst = arith.constant dense<0.000000e+00> : vector<640xf32>
    %66 = vector.multi_reduction <add>, %65, %cst [0, 1, 2] : vector<1x7x7x640xf32> to vector<640xf32>
    %67 = vector.shape_cast %66 : vector<640xf32> to vector<1x1x1x640xf32>
    %cst_14 = arith.constant 4.900000e+01 : f32
    %68 = vector.broadcast %cst_14 : f32 to vector<1x1x1x640xf32>
    %69 = arith.divf %67, %68 : vector<1x1x1x640xf32>
    %70 = vector.broadcast %69 : vector<1x1x1x640xf32> to vector<1x7x7x640xf32>
    %71 = arith.subf %65, %70 : vector<1x7x7x640xf32>
    %72 = arith.mulf %71, %71 : vector<1x7x7x640xf32>
    %cst_15 = arith.constant dense<0.000000e+00> : vector<640xf32>
    %73 = vector.multi_reduction <add>, %72, %cst_15 [0, 1, 2] : vector<1x7x7x640xf32> to vector<640xf32>
    %74 = vector.shape_cast %73 : vector<640xf32> to vector<1x1x1x640xf32>
    %cst_16 = arith.constant 4.900000e+01 : f32
    %75 = vector.broadcast %cst_16 : f32 to vector<1x1x1x640xf32>
    %76 = arith.divf %74, %75 : vector<1x1x1x640xf32>
    %cst_17 = arith.constant 1.000000e-03 : f32
    %77 = vector.broadcast %cst_17 : f32 to vector<1x1x1x640xf32>
    %78 = arith.addf %76, %77 : vector<1x1x1x640xf32>
    %79 = math.rsqrt %78 : vector<1x1x1x640xf32>
    %c0_18 = arith.constant 0 : index
    %c0_19 = arith.constant 0 : index
    %80 = vector.load %arg5[%c0_18, %c0_19] : memref<1x640xf32, #tpu.memory_space<vmem>>, vector<1x640xf32>
    %81 = vector.shape_cast %80 : vector<1x640xf32> to vector<1x1x1x640xf32>
    %c0_20 = arith.constant 0 : index
    %c0_21 = arith.constant 0 : index
    %82 = vector.load %arg6[%c0_20, %c0_21] : memref<1x640xf32, #tpu.memory_space<vmem>>, vector<1x640xf32>
    %83 = vector.shape_cast %82 : vector<1x640xf32> to vector<1x1x1x640xf32>
    %84 = vector.broadcast %79 : vector<1x1x1x640xf32> to vector<1x7x7x640xf32>
    %85 = arith.mulf %71, %84 : vector<1x7x7x640xf32>
    %86 = vector.broadcast %81 : vector<1x1x1x640xf32> to vector<1x7x7x640xf32>
    %87 = arith.mulf %85, %86 : vector<1x7x7x640xf32>
    %88 = vector.broadcast %83 : vector<1x1x1x640xf32> to vector<1x7x7x640xf32>
    %89 = arith.addf %87, %88 : vector<1x7x7x640xf32>
    %c0_22 = arith.constant 0 : index
    %c0_23 = arith.constant 0 : index
    %c0_24 = arith.constant 0 : index
    %c0_25 = arith.constant 0 : index
    %90 = vector.load %arg7[%c0_22, %c0_23, %c0_24, %c0_25] : memref<1x7x7x640xf32, #tpu.memory_space<vmem>>, vector<1x7x7x640xf32>
    tpu.vector_store %arg7[%c0_22, %c0_23, %c0_24, %c0_25], %89 {strides = array<i32>} : memref<1x7x7x640xf32, #tpu.memory_space<vmem>>, vector<1x7x7x640xf32>,
    return
  }
  func.func @transform_0(%arg0: i32) -> (i32, i32, i32, i32) {
    %c0_i32 = arith.constant 0 : i32
    %c0_i32_0 = arith.constant 0 : i32
    %c0_i32_1 = arith.constant 0 : i32
    %c0_i32_2 = arith.constant 0 : i32
    return %c0_i32, %c0_i32_0, %c0_i32_1, %arg0 : i32, i32, i32, i32
  }
  func.func @transform_1(%arg0: i32) -> (i32, i32, i32, i32) {
    %c0_i32 = arith.constant 0 : i32
    %c0_i32_0 = arith.constant 0 : i32
    %c0_i32_1 = arith.constant 0 : i32
    %c0_i32_2 = arith.constant 0 : i32
    return %c0_i32, %c0_i32_0, %c0_i32_1, %arg0 : i32, i32, i32, i32
  }
  func.func @transform_2(%arg0: i32) -> (i32, i32, i32, i32) {
    %c0_i32 = arith.constant 0 : i32
    %c0_i32_0 = arith.constant 0 : i32
    %c0_i32_1 = arith.constant 0 : i32
    %c0_i32_2 = arith.constant 0 : i32
    return %c0_i32, %c0_i32_0, %c0_i32_1, %arg0 : i32, i32, i32, i32
  }
  func.func @transform_3(%arg0: i32) -> (i32, i32, i32) {
    %c0_i32 = arith.constant 0 : i32
    %c0_i32_0 = arith.constant 0 : i32
    %c0_i32_1 = arith.constant 0 : i32
    return %c0_i32, %c0_i32_0, %arg0 : i32, i32, i32
  }
  func.func @transform_4(%arg0: i32) -> (i32, i32) {
    %c0_i32 = arith.constant 0 : i32
    %c0_i32_0 = arith.constant 0 : i32
    return %c0_i32, %arg0 : i32, i32
  }
  func.func @transform_5(%arg0: i32) -> (i32, i32) {
    %c0_i32 = arith.constant 0 : i32
    %c0_i32_0 = arith.constant 0 : i32
    return %c0_i32, %arg0 : i32, i32
  }
  func.func @transform_6(%arg0: i32) -> (i32, i32, i32, i32) {
    %c0_i32 = arith.constant 0 : i32
    %c0_i32_0 = arith.constant 0 : i32
    %c0_i32_1 = arith.constant 0 : i32
    %c0_i32_2 = arith.constant 0 : i32
    return %c0_i32, %c0_i32_0, %c0_i32_1, %arg0 : i32, i32, i32, i32
  }
}

</mosaic_0001>

<bundles_post_ra>
// kernel: tpu_custom_call.1
= control target key start
LH: loop header
LB: loop body
LE: loop exit
PB: predicated region body
PF: predicated region fallthrough
CT: control target
= control target key end

     0   :  { %s2699_s21 = smov 0   ;;  %s2701_s22 = smov 0   ;;  %s4189_s0 = inlined_call_operand.vmem [shape: f32[1,9,7,1920], index: 0, kind: input, shape index: {}]   ;;  %s4190_s1 = inlined_call_operand.vmem [shape: f32[1,9,7,1920], index: 1, kind: input, shape index: {}]   ;;  %s4191_s2 = inlined_call_operand.vmem [shape: f32[1,9,7,1920], index: 2, kind: input, shape index: {}]   ;;  %s4192_s3 = inlined_call_operand.vmem [shape: f32[3,3,1920], index: 3, kind: input, shape index: {}]   ;;  %s4193_s4 = inlined_call_operand.vmem [shape: f32[1,1920], index: 4, kind: input, shape index: {}]   ;;  %s4194_s5 = inlined_call_operand.vmem [shape: f32[1,1920], index: 5, kind: input, shape index: {}]   ;;  %s4195_s6 = inlined_call_operand.vmem [shape: f32[1,7,7,1920], index: 6, kind: output, shape index: {}]  }
   0x1   :  { %s2703_s23 = smov 0  }
   0x2 LB: > { %s2715_s24 = sadd.s32 4294967295, %s2662_s23   ;;  %s2718_s25 = sadd.s32 1, %s2662_s23   ;;  %s2662_s23 = sphi %s2703_s23, %s4283_s23   ;;  %s2658_s22 = sphi %s2701_s22, %s4282_s22   ;;  %s2654_s21 = sphi %s2699_s21, %s4281_s21  }
   0x3   : > { %s20_s26 = ssub.s32 %s2662_s23, %s2718_s25  ;;  %s23_s27 = sadd.s32 1, %s2658_s22 }
   0x4   : > { %p21_p0 = scmp.eq.s32.totalorder %s20_s26, 0  ;;  %p30_p1 = scmp.ne.s32.totalorder %s2658_s22, %s2654_s21 }
   0x5   : > { %p31_p2 = scmp.eq.s32.totalorder %s2662_s23, 0  ;;  %p190_p3 = scmp.eq.s32.totalorder %s2715_s24, 2 }
   0x6   : > { %s2728_s28 = scalar_select %p21_p0, %s2658_s22, %s23_s27  }
   0x7   : > { %p2730_p4 = por %p31_p2, %p30_p1  ;;  %p2734_p5 = por %p190_p3, %p30_p1 }
   0x8   : > { %p2577_p6 = scmp.ge.s32.totalorder %s2662_s23, 3 }
   0xa   : > { %212 = sbr.rel (%p2577_p6) target bundleno = 111 (0x6f), region = 16 }
  0x11   : > { %215 = sbr.rel (!%p2730_p4) target bundleno = 45 (0x2d), region = 20  ;;  %s217_s7 = sand.u32 (%p2730_p4), 1, %s2658_s22  }
  0x12   : > { %s2592_s8 = smul.u32 (%p2730_p4), 40, %s2662_s23 }
  0x13   : > { %s2597_s9 = smul.u32 (%p2730_p4), 360, %s217_s7 }
  0x14   : > { %s2746_s12 = scalar_lea.vmem (%p2730_p4), %s4189_s0, %s2592_s8 }
  0x15   : > { %v235_v0 = vld [vmem:[%s2746_s12] sm:$0xff] (%p2730_p4)  ;;  %v237_v1 = vld [vmem:[%s2746_s12 + $0x8] sm:$0xff] (%p2730_p4)  ;;  %v239_v2 = vld [vmem:[%s2746_s12 + $0x10] sm:$0xff] (%p2730_p4)  ;;  %s2751_s13 = scalar_lea.vmem (%p2730_p4), [#allocation2], %s2597_s9 }
  0x16   : > { %236 = vst [vmem:[%s2751_s13] sm:$0xff] (%p2730_p4), %v235_v0  ;;  %238 = vst [vmem:[%s2751_s13 + $0x8] sm:$0xff] (%p2730_p4), %v237_v1  ;;  %v241_v3 = vld [vmem:[%s2746_s12 + $0x18] sm:$0xff] (%p2730_p4)  ;;  %v243_v4 = vld [vmem:[%s2746_s12 + $0x20] sm:$0xff] (%p2730_p4) }
  0x17   : > { %240 = vst [vmem:[%s2751_s13 + $0x10] sm:$0xff] (%p2730_p4), %v239_v2  ;;  %v245_v5 = vld [vmem:[%s2746_s12 + $0x78] sm:$0xff] (%p2730_p4)  ;;  %242 = vst [vmem:[%s2751_s13 + $0x18] sm:$0xff] (%p2730_p4), %v241_v3  ;;  %v247_v6 = vld [vmem:[%s2746_s12 + $0x80] sm:$0xff] (%p2730_p4) }
  0x18   : > { %244 = vst [vmem:[%s2751_s13 + $0x20] sm:$0xff] %v243_v4  ;;  %246 = vst [vmem:[%s2751_s13 + $0x28] sm:$0xff] %v245_v5  ;;  %v249_v7 = vld [vmem:[%s2746_s12 + $0x88] sm:$0xff]  ;;  %v251_v8 = vld [vmem:[%s2746_s12 + $0x90] sm:$0xff] }
  0x19   : > { %248 = vst [vmem:[%s2751_s13 + $0x30] sm:$0xff] %v247_v6  ;;  %250 = vst [vmem:[%s2751_s13 + $0x38] sm:$0xff] %v249_v7  ;;  %v253_v9 = vld [vmem:[%s2746_s12 + $0x98] sm:$0xff]  ;;  %v255_v10 = vld [vmem:[%s2746_s12 + $0xf0] sm:$0xff] }
  0x1a   : > { %252 = vst [vmem:[%s2751_s13 + $0x40] sm:$0xff] %v251_v8  ;;  %v257_v11 = vld [vmem:[%s2746_s12 + $0xf8] sm:$0xff]  ;;  %254 = vst [vmem:[%s2751_s13 + $0x48] sm:$0xff] %v253_v9  ;;  %v259_v12 = vld [vmem:[%s2746_s12 + $0x100] sm:$0xff] }
  0x1b   : > { %256 = vst [vmem:[%s2751_s13 + $0x50] sm:$0xff] %v255_v10  ;;  %258 = vst [vmem:[%s2751_s13 + $0x58] sm:$0xff] %v257_v11  ;;  %v261_v13 = vld [vmem:[%s2746_s12 + $0x108] sm:$0xff]  ;;  %v263_v14 = vld [vmem:[%s2746_s12 + $0x110] sm:$0xff] }
  0x1c   : > { %260 = vst [vmem:[%s2751_s13 + $0x60] sm:$0xff] %v259_v12  ;;  %262 = vst [vmem:[%s2751_s13 + $0x68] sm:$0xff] %v261_v13  ;;  %v265_v15 = vld [vmem:[%s2746_s12 + $0x168] sm:$0xff]  ;;  %v267_v16 = vld [vmem:[%s2746_s12 + $0x170] sm:$0xff] }
  0x1d   : > { %264 = vst [vmem:[%s2751_s13 + $0x70] sm:$0xff] %v263_v14  ;;  %v269_v17 = vld [vmem:[%s2746_s12 + $0x178] sm:$0xff]  ;;  %266 = vst [vmem:[%s2751_s13 + $0x78] sm:$0xff] %v265_v15  ;;  %v271_v18 = vld [vmem:[%s2746_s12 + $0x180] sm:$0xff] }
  0x1e   : > { %268 = vst [vmem:[%s2751_s13 + $0x80] sm:$0xff] %v267_v16  ;;  %270 = vst [vmem:[%s2751_s13 + $0x88] sm:$0xff] %v269_v17  ;;  %v273_v19 = vld [vmem:[%s2746_s12 + $0x188] sm:$0xff]  ;;  %v275_v20 = vld [vmem:[%s2746_s12 + $0x1e0] sm:$0xff] }
  0x1f   : > { %272 = vst [vmem:[%s2751_s13 + $0x90] sm:$0xff] %v271_v18  ;;  %274 = vst [vmem:[%s2751_s13 + $0x98] sm:$0xff] %v273_v19  ;;  %v277_v21 = vld [vmem:[%s2746_s12 + $0x1e8] sm:$0xff]  ;;  %v279_v22 = vld [vmem:[%s2746_s12 + $0x1f0] sm:$0xff] }
  0x20   : > { %276 = vst [vmem:[%s2751_s13 + $0xa0] sm:$0xff] %v275_v20  ;;  %v281_v23 = vld [vmem:[%s2746_s12 + $0x1f8] sm:$0xff]  ;;  %278 = vst [vmem:[%s2751_s13 + $0xa8] sm:$0xff] %v277_v21  ;;  %v283_v24 = vld [vmem:[%s2746_s12 + $0x200] sm:$0xff] }
  0x21   : > { %280 = vst [vmem:[%s2751_s13 + $0xb0] sm:$0xff] %v279_v22  ;;  %282 = vst [vmem:[%s2751_s13 + $0xb8] sm:$0xff] %v281_v23  ;;  %v285_v25 = vld [vmem:[%s2746_s12 + $0x258] sm:$0xff]  ;;  %v287_v26 = vld [vmem:[%s2746_s12 + $0x260] sm:$0xff] }
  0x22   : > { %284 = vst [vmem:[%s2751_s13 + $0xc0] sm:$0xff] %v283_v24  ;;  %286 = vst [vmem:[%s2751_s13 + $0xc8] sm:$0xff] %v285_v25  ;;  %v289_v27 = vld [vmem:[%s2746_s12 + $0x268] sm:$0xff]  ;;  %v291_v28 = vld [vmem:[%s2746_s12 + $0x270] sm:$0xff] }
  0x23   : > { %288 = vst [vmem:[%s2751_s13 + $0xd0] sm:$0xff] %v287_v26  ;;  %v293_v29 = vld [vmem:[%s2746_s12 + $0x278] sm:$0xff]  ;;  %290 = vst [vmem:[%s2751_s13 + $0xd8] sm:$0xff] %v289_v27  ;;  %v295_v30 = vld [vmem:[%s2746_s12 + $0x2d0] sm:$0xff] }
  0x24   : > { %292 = vst [vmem:[%s2751_s13 + $0xe0] sm:$0xff] %v291_v28  ;;  %294 = vst [vmem:[%s2751_s13 + $0xe8] sm:$0xff] %v293_v29  ;;  %v297_v31 = vld [vmem:[%s2746_s12 + $0x2d8] sm:$0xff]  ;;  %v299_v32 = vld [vmem:[%s2746_s12 + $0x2e0] sm:$0xff] }
  0x25   : > { %296 = vst [vmem:[%s2751_s13 + $0xf0] sm:$0xff] %v295_v30  ;;  %298 = vst [vmem:[%s2751_s13 + $0xf8] sm:$0xff] %v297_v31  ;;  %v301_v33 = vld [vmem:[%s2746_s12 + $0x2e8] sm:$0xff]  ;;  %v303_v34 = vld [vmem:[%s2746_s12 + $0x2f0] sm:$0xff] }
  0x26   : > { %300 = vst [vmem:[%s2751_s13 + $0x100] sm:$0xff] %v299_v32  ;;  %v305_v35 = vld [vmem:[%s2746_s12 + $0x348] sm:$0xff]  ;;  %302 = vst [vmem:[%s2751_s13 + $0x108] sm:$0xff] %v301_v33  ;;  %v307_v36 = vld [vmem:[%s2746_s12 + $0x350] sm:$0xff] }
  0x27   : > { %304 = vst [vmem:[%s2751_s13 + $0x110] sm:$0xff] %v303_v34  ;;  %306 = vst [vmem:[%s2751_s13 + $0x118] sm:$0xff] %v305_v35  ;;  %v309_v37 = vld [vmem:[%s2746_s12 + $0x358] sm:$0xff]  ;;  %v311_v38 = vld [vmem:[%s2746_s12 + $0x360] sm:$0xff] }
  0x28   : > { %308 = vst [vmem:[%s2751_s13 + $0x120] sm:$0xff] %v307_v36  ;;  %310 = vst [vmem:[%s2751_s13 + $0x128] sm:$0xff] %v309_v37  ;;  %v313_v39 = vld [vmem:[%s2746_s12 + $0x368] sm:$0xff]  ;;  %v315_v40 = vld [vmem:[%s2746_s12 + $0x3c0] sm:$0xff] }
  0x29   : > { %312 = vst [vmem:[%s2751_s13 + $0x130] sm:$0xff] %v311_v38  ;;  %v317_v41 = vld [vmem:[%s2746_s12 + $0x3c8] sm:$0xff]  ;;  %314 = vst [vmem:[%s2751_s13 + $0x138] sm:$0xff] %v313_v39  ;;  %v319_v42 = vld [vmem:[%s2746_s12 + $0x3d0] sm:$0xff] }
  0x2a   : > { %316 = vst [vmem:[%s2751_s13 + $0x140] sm:$0xff] %v315_v40  ;;  %318 = vst [vmem:[%s2751_s13 + $0x148] sm:$0xff] %v317_v41  ;;  %v321_v43 = vld [vmem:[%s2746_s12 + $0x3d8] sm:$0xff]  ;;  %v323_v44 = vld [vmem:[%s2746_s12 + $0x3e0] sm:$0xff] }
  0x2b   : > { %320 = vst [vmem:[%s2751_s13 + $0x150] sm:$0xff] %v319_v42  ;;  %322 = vst [vmem:[%s2751_s13 + $0x158] sm:$0xff] %v321_v43 }
  0x2c   : > { %324 = vst [vmem:[%s2751_s13 + $0x160] sm:$0xff] %v323_v44 }
  0x2d PF: > { %330 = sbr.rel (!%p2730_p4) target bundleno = 73 (0x49), region = 43  ;;  %s332_s14 = sand.u32 (%p2730_p4), 1, %s2658_s22  }
  0x2e   : > { %s2593_s15 = smul.u32 (%p2730_p4), 40, %s2662_s23 }
  0x2f   : > { %s2598_s16 = smul.u32 (%p2730_p4), 360, %s332_s14 }
  0x30   : > { %s2847_s19 = scalar_lea.vmem (%p2730_p4), %s4190_s1, %s2593_s15 }
  0x31   : > { %v350_v45 = vld [vmem:[%s2847_s19] sm:$0xff] (%p2730_p4)  ;;  %v352_v46 = vld [vmem:[%s2847_s19 + $0x8] sm:$0xff] (%p2730_p4)  ;;  %v354_v47 = vld [vmem:[%s2847_s19 + $0x10] sm:$0xff] (%p2730_p4)  ;;  %s2852_s20 = scalar_lea.vmem (%p2730_p4), [#allocation3], %s2598_s16 }
  0x32   : > { %351 = vst [vmem:[%s2852_s20] sm:$0xff] (%p2730_p4), %v350_v45  ;;  %353 = vst [vmem:[%s2852_s20 + $0x8] sm:$0xff] (%p2730_p4), %v352_v46  ;;  %v356_v48 = vld [vmem:[%s2847_s19 + $0x18] sm:$0xff] (%p2730_p4)  ;;  %v358_v49 = vld [vmem:[%s2847_s19 + $0x20] sm:$0xff] (%p2730_p4) }
  0x33   : > { %355 = vst [vmem:[%s2852_s20 + $0x10] sm:$0xff] (%p2730_p4), %v354_v47  ;;  %v360_v50 = vld [vmem:[%s2847_s19 + $0x78] sm:$0xff] (%p2730_p4)  ;;  %357 = vst [vmem:[%s2852_s20 + $0x18] sm:$0xff] (%p2730_p4), %v356_v48  ;;  %v362_v51 = vld [vmem:[%s2847_s19 + $0x80] sm:$0xff] (%p2730_p4) }
  0x34   : > { %359 = vst [vmem:[%s2852_s20 + $0x20] sm:$0xff] %v358_v49  ;;  %361 = vst [vmem:[%s2852_s20 + $0x28] sm:$0xff] %v360_v50  ;;  %v364_v52 = vld [vmem:[%s2847_s19 + $0x88] sm:$0xff]  ;;  %v366_v53 = vld [vmem:[%s2847_s19 + $0x90] sm:$0xff] }
  0x35   : > { %363 = vst [vmem:[%s2852_s20 + $0x30] sm:$0xff] %v362_v51  ;;  %365 = vst [vmem:[%s2852_s20 + $0x38] sm:$0xff] %v364_v52  ;;  %v368_v54 = vld [vmem:[%s2847_s19 + $0x98] sm:$0xff]  ;;  %v370_v55 = vld [vmem:[%s2847_s19 + $0xf0] sm:$0xff] }
  0x36   : > { %367 = vst [vmem:[%s2852_s20 + $0x40] sm:$0xff] %v366_v53  ;;  %v372_v56 = vld [vmem:[%s2847_s19 + $0xf8] sm:$0xff]  ;;  %369 = vst [vmem:[%s2852_s20 + $0x48] sm:$0xff] %v368_v54  ;;  %v374_v57 = vld [vmem:[%s2847_s19 + $0x100] sm:$0xff] }
  0x37   : > { %371 = vst [vmem:[%s2852_s20 + $0x50] sm:$0xff] %v370_v55  ;;  %373 = vst [vmem:[%s2852_s20 + $0x58] sm:$0xff] %v372_v56  ;;  %v376_v58 = vld [vmem:[%s2847_s19 + $0x108] sm:$0xff]  ;;  %v378_v59 = vld [vmem:[%s2847_s19 + $0x110] sm:$0xff] }
  0x38   : > { %375 = vst [vmem:[%s2852_s20 + $0x60] sm:$0xff] %v374_v57  ;;  %377 = vst [vmem:[%s2852_s20 + $0x68] sm:$0xff] %v376_v58  ;;  %v380_v60 = vld [vmem:[%s2847_s19 + $0x168] sm:$0xff]  ;;  %v382_v61 = vld [vmem:[%s2847_s19 + $0x170] sm:$0xff] }
  0x39   : > { %379 = vst [vmem:[%s2852_s20 + $0x70] sm:$0xff] %v378_v59  ;;  %v384_v62 = vld [vmem:[%s2847_s19 + $0x178] sm:$0xff]  ;;  %381 = vst [vmem:[%s2852_s20 + $0x78] sm:$0xff] %v380_v60  ;;  %v386_v63 = vld [vmem:[%s2847_s19 + $0x180] sm:$0xff] }
  0x3a   : > { %383 = vst [vmem:[%s2852_s20 + $0x80] sm:$0xff] %v382_v61  ;;  %385 = vst [vmem:[%s2852_s20 + $0x88] sm:$0xff] %v384_v62  ;;  %v388_v0 = vld [vmem:[%s2847_s19 + $0x188] sm:$0xff]  ;;  %v390_v1 = vld [vmem:[%s2847_s19 + $0x1e0] sm:$0xff] }
  0x3b   : > { %387 = vst [vmem:[%s2852_s20 + $0x90] sm:$0xff] %v386_v63  ;;  %389 = vst [vmem:[%s2852_s20 + $0x98] sm:$0xff] %v388_v0  ;;  %v392_v2 = vld [vmem:[%s2847_s19 + $0x1e8] sm:$0xff]  ;;  %v394_v3 = vld [vmem:[%s2847_s19 + $0x1f0] sm:$0xff] }
  0x3c   : > { %391 = vst [vmem:[%s2852_s20 + $0xa0] sm:$0xff] %v390_v1  ;;  %v396_v4 = vld [vmem:[%s2847_s19 + $0x1f8] sm:$0xff]  ;;  %393 = vst [vmem:[%s2852_s20 + $0xa8] sm:$0xff] %v392_v2  ;;  %v398_v5 = vld [vmem:[%s2847_s19 + $0x200] sm:$0xff] }
  0x3d   : > { %395 = vst [vmem:[%s2852_s20 + $0xb0] sm:$0xff] %v394_v3  ;;  %397 = vst [vmem:[%s2852_s20 + $0xb8] sm:$0xff] %v396_v4  ;;  %v400_v6 = vld [vmem:[%s2847_s19 + $0x258] sm:$0xff]  ;;  %v402_v7 = vld [vmem:[%s2847_s19 + $0x260] sm:$0xff] }
  0x3e   : > { %399 = vst [vmem:[%s2852_s20 + $0xc0] sm:$0xff] %v398_v5  ;;  %401 = vst [vmem:[%s2852_s20 + $0xc8] sm:$0xff] %v400_v6  ;;  %v404_v8 = vld [vmem:[%s2847_s19 + $0x268] sm:$0xff]  ;;  %v406_v9 = vld [vmem:[%s2847_s19 + $0x270] sm:$0xff] }
  0x3f   : > { %403 = vst [vmem:[%s2852_s20 + $0xd0] sm:$0xff] %v402_v7  ;;  %v408_v10 = vld [vmem:[%s2847_s19 + $0x278] sm:$0xff]  ;;  %405 = vst [vmem:[%s2852_s20 + $0xd8] sm:$0xff] %v404_v8  ;;  %v410_v11 = vld [vmem:[%s2847_s19 + $0x2d0] sm:$0xff] }
  0x40   : > { %407 = vst [vmem:[%s2852_s20 + $0xe0] sm:$0xff] %v406_v9  ;;  %409 = vst [vmem:[%s2852_s20 + $0xe8] sm:$0xff] %v408_v10  ;;  %v412_v12 = vld [vmem:[%s2847_s19 + $0x2d8] sm:$0xff]  ;;  %v414_v13 = vld [vmem:[%s2847_s19 + $0x2e0] sm:$0xff] }
  0x41   : > { %411 = vst [vmem:[%s2852_s20 + $0xf0] sm:$0xff] %v410_v11  ;;  %413 = vst [vmem:[%s2852_s20 + $0xf8] sm:$0xff] %v412_v12  ;;  %v416_v14 = vld [vmem:[%s2847_s19 + $0x2e8] sm:$0xff]  ;;  %v418_v15 = vld [vmem:[%s2847_s19 + $0x2f0] sm:$0xff] }
  0x42   : > { %415 = vst [vmem:[%s2852_s20 + $0x100] sm:$0xff] %v414_v13  ;;  %v420_v16 = vld [vmem:[%s2847_s19 + $0x348] sm:$0xff]  ;;  %417 = vst [vmem:[%s2852_s20 + $0x108] sm:$0xff] %v416_v14  ;;  %v422_v17 = vld [vmem:[%s2847_s19 + $0x350] sm:$0xff] }
  0x43   : > { %419 = vst [vmem:[%s2852_s20 + $0x110] sm:$0xff] %v418_v15  ;;  %421 = vst [vmem:[%s2852_s20 + $0x118] sm:$0xff] %v420_v16  ;;  %v424_v18 = vld [vmem:[%s2847_s19 + $0x358] sm:$0xff]  ;;  %v426_v19 = vld [vmem:[%s2847_s19 + $0x360] sm:$0xff] }
  0x44   : > { %423 = vst [vmem:[%s2852_s20 + $0x120] sm:$0xff] %v422_v17  ;;  %425 = vst [vmem:[%s2852_s20 + $0x128] sm:$0xff] %v424_v18  ;;  %v428_v20 = vld [vmem:[%s2847_s19 + $0x368] sm:$0xff]  ;;  %v430_v21 = vld [vmem:[%s2847_s19 + $0x3c0] sm:$0xff] }
  0x45   : > { %427 = vst [vmem:[%s2852_s20 + $0x130] sm:$0xff] %v426_v19  ;;  %v432_v22 = vld [vmem:[%s2847_s19 + $0x3c8] sm:$0xff]  ;;  %429 = vst [vmem:[%s2852_s20 + $0x138] sm:$0xff] %v428_v20  ;;  %v434_v23 = vld [vmem:[%s2847_s19 + $0x3d0] sm:$0xff] }
  0x46   : > { %431 = vst [vmem:[%s2852_s20 + $0x140] sm:$0xff] %v430_v21  ;;  %433 = vst [vmem:[%s2852_s20 + $0x148] sm:$0xff] %v432_v22  ;;  %v436_v24 = vld [vmem:[%s2847_s19 + $0x3d8] sm:$0xff]  ;;  %v438_v25 = vld [vmem:[%s2847_s19 + $0x3e0] sm:$0xff] }
  0x47   : > { %435 = vst [vmem:[%s2852_s20 + $0x150] sm:$0xff] %v434_v23  ;;  %437 = vst [vmem:[%s2852_s20 + $0x158] sm:$0xff] %v436_v24 }
  0x48   : > { %439 = vst [vmem:[%s2852_s20 + $0x160] sm:$0xff] %v438_v25 }
  0x49 PF: > { %445 = sbr.rel (!%p2730_p4) target bundleno = 101 (0x65), region = 66  ;;  %s447_s26 = sand.u32 (%p2730_p4), 1, %s2658_s22  }
  0x4a   : > { %s2594_s27 = smul.u32 (%p2730_p4), 40, %s2662_s23 }
  0x4b   : > { %s2599_s7 = smul.u32 (%p2730_p4), 360, %s447_s26 }
  0x4c   : > { %s2948_s10 = scalar_lea.vmem (%p2730_p4), %s4191_s2, %s2594_s27 }
  0x4d   : > { %v465_v26 = vld [vmem:[%s2948_s10] sm:$0xff] (%p2730_p4)  ;;  %v467_v27 = vld [vmem:[%s2948_s10 + $0x8] sm:$0xff] (%p2730_p4)  ;;  %v469_v28 = vld [vmem:[%s2948_s10 + $0x10] sm:$0xff] (%p2730_p4)  ;;  %s2953_s11 = scalar_lea.vmem (%p2730_p4), [#allocation4], %s2599_s7 }
  0x4e   : > { %466 = vst [vmem:[%s2953_s11] sm:$0xff] (%p2730_p4), %v465_v26  ;;  %468 = vst [vmem:[%s2953_s11 + $0x8] sm:$0xff] (%p2730_p4), %v467_v27  ;;  %v471_v29 = vld [vmem:[%s2948_s10 + $0x18] sm:$0xff] (%p2730_p4)  ;;  %v473_v30 = vld [vmem:[%s2948_s10 + $0x20] sm:$0xff] (%p2730_p4) }
  0x4f   : > { %470 = vst [vmem:[%s2953_s11 + $0x10] sm:$0xff] (%p2730_p4), %v469_v28  ;;  %v475_v31 = vld [vmem:[%s2948_s10 + $0x78] sm:$0xff] (%p2730_p4)  ;;  %472 = vst [vmem:[%s2953_s11 + $0x18] sm:$0xff] (%p2730_p4), %v471_v29  ;;  %v477_v32 = vld [vmem:[%s2948_s10 + $0x80] sm:$0xff] (%p2730_p4) }
  0x50   : > { %474 = vst [vmem:[%s2953_s11 + $0x20] sm:$0xff] %v473_v30  ;;  %476 = vst [vmem:[%s2953_s11 + $0x28] sm:$0xff] %v475_v31  ;;  %v479_v33 = vld [vmem:[%s2948_s10 + $0x88] sm:$0xff]  ;;  %v481_v34 = vld [vmem:[%s2948_s10 + $0x90] sm:$0xff] }
  0x51   : > { %478 = vst [vmem:[%s2953_s11 + $0x30] sm:$0xff] %v477_v32  ;;  %480 = vst [vmem:[%s2953_s11 + $0x38] sm:$0xff] %v479_v33  ;;  %v483_v35 = vld [vmem:[%s2948_s10 + $0x98] sm:$0xff]  ;;  %v485_v36 = vld [vmem:[%s2948_s10 + $0xf0] sm:$0xff] }
  0x52   : > { %482 = vst [vmem:[%s2953_s11 + $0x40] sm:$0xff] %v481_v34  ;;  %v487_v37 = vld [vmem:[%s2948_s10 + $0xf8] sm:$0xff]  ;;  %484 = vst [vmem:[%s2953_s11 + $0x48] sm:$0xff] %v483_v35  ;;  %v489_v38 = vld [vmem:[%s2948_s10 + $0x100] sm:$0xff] }
  0x53   : > { %486 = vst [vmem:[%s2953_s11 + $0x50] sm:$0xff] %v485_v36  ;;  %488 = vst [vmem:[%s2953_s11 + $0x58] sm:$0xff] %v487_v37  ;;  %v491_v39 = vld [vmem:[%s2948_s10 + $0x108] sm:$0xff]  ;;  %v493_v40 = vld [vmem:[%s2948_s10 + $0x110] sm:$0xff] }
  0x54   : > { %490 = vst [vmem:[%s2953_s11 + $0x60] sm:$0xff] %v489_v38  ;;  %492 = vst [vmem:[%s2953_s11 + $0x68] sm:$0xff] %v491_v39  ;;  %v495_v41 = vld [vmem:[%s2948_s10 + $0x168] sm:$0xff]  ;;  %v497_v42 = vld [vmem:[%s2948_s10 + $0x170] sm:$0xff] }
  0x55   : > { %494 = vst [vmem:[%s2953_s11 + $0x70] sm:$0xff] %v493_v40  ;;  %v499_v43 = vld [vmem:[%s2948_s10 + $0x178] sm:$0xff]  ;;  %496 = vst [vmem:[%s2953_s11 + $0x78] sm:$0xff] %v495_v41  ;;  %v501_v44 = vld [vmem:[%s2948_s10 + $0x180] sm:$0xff] }
  0x56   : > { %498 = vst [vmem:[%s2953_s11 + $0x80] sm:$0xff] %v497_v42  ;;  %500 = vst [vmem:[%s2953_s11 + $0x88] sm:$0xff] %v499_v43  ;;  %v503_v45 = vld [vmem:[%s2948_s10 + $0x188] sm:$0xff]  ;;  %v505_v46 = vld [vmem:[%s2948_s10 + $0x1e0] sm:$0xff] }
  0x57   : > { %502 = vst [vmem:[%s2953_s11 + $0x90] sm:$0xff] %v501_v44  ;;  %504 = vst [vmem:[%s2953_s11 + $0x98] sm:$0xff] %v503_v45  ;;  %v507_v47 = vld [vmem:[%s2948_s10 + $0x1e8] sm:$0xff]  ;;  %v509_v48 = vld [vmem:[%s2948_s10 + $0x1f0] sm:$0xff] }
  0x58   : > { %506 = vst [vmem:[%s2953_s11 + $0xa0] sm:$0xff] %v505_v46  ;;  %v511_v49 = vld [vmem:[%s2948_s10 + $0x1f8] sm:$0xff]  ;;  %508 = vst [vmem:[%s2953_s11 + $0xa8] sm:$0xff] %v507_v47  ;;  %v513_v50 = vld [vmem:[%s2948_s10 + $0x200] sm:$0xff] }
  0x59   : > { %510 = vst [vmem:[%s2953_s11 + $0xb0] sm:$0xff] %v509_v48  ;;  %512 = vst [vmem:[%s2953_s11 + $0xb8] sm:$0xff] %v511_v49  ;;  %v515_v51 = vld [vmem:[%s2948_s10 + $0x258] sm:$0xff]  ;;  %v517_v52 = vld [vmem:[%s2948_s10 + $0x260] sm:$0xff] }
  0x5a   : > { %514 = vst [vmem:[%s2953_s11 + $0xc0] sm:$0xff] %v513_v50  ;;  %516 = vst [vmem:[%s2953_s11 + $0xc8] sm:$0xff] %v515_v51  ;;  %v519_v53 = vld [vmem:[%s2948_s10 + $0x268] sm:$0xff]  ;;  %v521_v54 = vld [vmem:[%s2948_s10 + $0x270] sm:$0xff] }
  0x5b   : > { %518 = vst [vmem:[%s2953_s11 + $0xd0] sm:$0xff] %v517_v52  ;;  %v523_v55 = vld [vmem:[%s2948_s10 + $0x278] sm:$0xff]  ;;  %520 = vst [vmem:[%s2953_s11 + $0xd8] sm:$0xff] %v519_v53  ;;  %v525_v56 = vld [vmem:[%s2948_s10 + $0x2d0] sm:$0xff] }
  0x5c   : > { %522 = vst [vmem:[%s2953_s11 + $0xe0] sm:$0xff] %v521_v54  ;;  %524 = vst [vmem:[%s2953_s11 + $0xe8] sm:$0xff] %v523_v55  ;;  %v527_v57 = vld [vmem:[%s2948_s10 + $0x2d8] sm:$0xff]  ;;  %v529_v58 = vld [vmem:[%s2948_s10 + $0x2e0] sm:$0xff] }
  0x5d   : > { %526 = vst [vmem:[%s2953_s11 + $0xf0] sm:$0xff] %v525_v56  ;;  %528 = vst [vmem:[%s2953_s11 + $0xf8] sm:$0xff] %v527_v57  ;;  %v531_v59 = vld [vmem:[%s2948_s10 + $0x2e8] sm:$0xff]  ;;  %v533_v60 = vld [vmem:[%s2948_s10 + $0x2f0] sm:$0xff] }
  0x5e   : > { %530 = vst [vmem:[%s2953_s11 + $0x100] sm:$0xff] %v529_v58  ;;  %v535_v61 = vld [vmem:[%s2948_s10 + $0x348] sm:$0xff]  ;;  %532 = vst [vmem:[%s2953_s11 + $0x108] sm:$0xff] %v531_v59  ;;  %v537_v62 = vld [vmem:[%s2948_s10 + $0x350] sm:$0xff] }
  0x5f   : > { %534 = vst [vmem:[%s2953_s11 + $0x110] sm:$0xff] %v533_v60  ;;  %536 = vst [vmem:[%s2953_s11 + $0x118] sm:$0xff] %v535_v61  ;;  %v539_v63 = vld [vmem:[%s2948_s10 + $0x358] sm:$0xff]  ;;  %v541_v0 = vld [vmem:[%s2948_s10 + $0x360] sm:$0xff] }
  0x60   : > { %538 = vst [vmem:[%s2953_s11 + $0x120] sm:$0xff] %v537_v62  ;;  %540 = vst [vmem:[%s2953_s11 + $0x128] sm:$0xff] %v539_v63  ;;  %v543_v1 = vld [vmem:[%s2948_s10 + $0x368] sm:$0xff]  ;;  %v545_v2 = vld [vmem:[%s2948_s10 + $0x3c0] sm:$0xff] }
  0x61   : > { %542 = vst [vmem:[%s2953_s11 + $0x130] sm:$0xff] %v541_v0  ;;  %v547_v3 = vld [vmem:[%s2948_s10 + $0x3c8] sm:$0xff]  ;;  %544 = vst [vmem:[%s2953_s11 + $0x138] sm:$0xff] %v543_v1  ;;  %v549_v4 = vld [vmem:[%s2948_s10 + $0x3d0] sm:$0xff] }
  0x62   : > { %546 = vst [vmem:[%s2953_s11 + $0x140] sm:$0xff] %v545_v2  ;;  %548 = vst [vmem:[%s2953_s11 + $0x148] sm:$0xff] %v547_v3  ;;  %v551_v5 = vld [vmem:[%s2948_s10 + $0x3d8] sm:$0xff]  ;;  %v553_v6 = vld [vmem:[%s2948_s10 + $0x3e0] sm:$0xff] }
  0x63   : > { %550 = vst [vmem:[%s2953_s11 + $0x150] sm:$0xff] %v549_v4  ;;  %552 = vst [vmem:[%s2953_s11 + $0x158] sm:$0xff] %v551_v5 }
  0x64   : > { %554 = vst [vmem:[%s2953_s11 + $0x160] sm:$0xff] %v553_v6 }
  0x65 PF: > { %560 = sbr.rel (!%p2730_p4) target bundleno = 111 (0x6f), region = 89  ;;  %s562_s12 = sand.u32 (%p2730_p4), 1, %s2658_s22  }
  0x66   : > { %s2595_s13 = smul.u32 (%p2730_p4), 20, %s2662_s23 }
  0x67   : > { %s2600_s14 = smul.u32 (%p2730_p4), 60, %s562_s12 }
  0x68   : > { %s567_s17 = scalar_lea.vmem (%p2730_p4), %s4192_s3, %s2595_s13 }
  0x69   : > { %v582_v7 = vld [vmem:[%s567_s17] sm:$0xff] (%p2730_p4)  ;;  %v584_v8 = vld [vmem:[%s567_s17 + $0x8] sm:$0xff] (%p2730_p4)  ;;  %s564_s18 = scalar_lea.vmem (%p2730_p4), [#allocation5], %s2600_s14  ;;  %v590_v11 = vld [vmem:[%s567_s17 + $0x78] sm:$0xff] (%p2730_p4) }
  0x6a   : > { %v586_v9 = vld [vmem:[%s567_s17 + $0x3c] sm:$0xff] (%p2730_p4)  ;;  %583 = vst [vmem:[%s564_s18] sm:$0xff] (%p2730_p4), %v582_v7  ;;  %585 = vst [vmem:[%s564_s18 + $0x8] sm:$0xff] (%p2730_p4), %v584_v8  ;;  %v588_v10 = vld [vmem:[%s567_s17 + $0x44] sm:$0xff] (%p2730_p4) }
  0x6b   : > { %587 = vst [vmem:[%s564_s18 + $0x14] sm:$0xff] (%p2730_p4), %v586_v9  ;;  %v592_v12 = vld [vmem:[%s567_s17 + $0x80] sm:$0xff] (%p2730_p4)  ;;  %589 = vst [vmem:[%s564_s18 + $0x1c] sm:$0xff] (%p2730_p4), %v588_v10  ;;  %v2582_v13 = vld [vmem:[%s567_s17 + $0x10] sm:$0xf] (%p2730_p4) }
  0x6c   : > { %591 = vst [vmem:[%s564_s18 + $0x28] sm:$0xff] %v590_v11  ;;  %593 = vst [vmem:[%s564_s18 + $0x30] sm:$0xff] %v592_v12  ;;  %v2584_v14 = vld [vmem:[%s567_s17 + $0x4c] sm:$0xf]  ;;  %v2586_v15 = vld [vmem:[%s567_s17 + $0x88] sm:$0xf] }
  0x6d   : > { %2583 = vst [vmem:[%s564_s18 + $0x10] sm:$0xf] %v2582_v13  ;;  %2585 = vst [vmem:[%s564_s18 + $0x24] sm:$0xf] %v2584_v14 }
  0x6e   : > { %2587 = vst [vmem:[%s564_s18 + $0x38] sm:$0xf] %v2586_v15 }
  0x6f PF: > { %p2588_p7 = scmp.ge.s32.totalorder %s2662_s23, 1  ;;  %p627_p8 = scmp.lt.s32.totalorder %s2662_s23, 4 }
  0x71   : > { %p628_p9 = pnand %p2588_p7, %p627_p8 }
  0x73   : > { %631 = sbr.rel (%p628_p9) target bundleno = 459 (0x1cb), region = 123 }
  0x7a   : > { %s3052_s29 = sand.u32 1, %s2654_s21   ;;  %v775_v16 = vlaneseq  ;;  %s707_s27 = smul.u32 5, %s2715_s24  ;;  %vm1871_vm0 = vcmask 1046528  }
  0x7b   : > { %s3055_s19 = smul.u32 360, %s3052_s29 }
  0x7c   : > { %s2602_s20 = smul.u32 60, %s3052_s29  ;;  %v3058_v17 = vshrl.u32 %v775_v16, 7  ;;  %p3139_p10 = scmp.lt.s32.totalorder %s707_s27, 14 }
  0x7d   : > { %s3087_s21 = scalar_lea.vmem [#allocation2], %s3055_s19  ;;  %s3119_s23 = scalar_lea.vmem [#allocation3], %s3055_s19 }
  0x7e   : > { %4225 = vst [vmem:[#allocation7_spill] sm:$0xff] %v3058_v17  ;;  %s3060_s26 = scalar_lea.vmem [#allocation5], %s2602_s20  ;;  %v3069_v20 = vsub.s32 0, %v3058_v17  ;;  %v3075_v22 = vsub.s32 1, %v3058_v17  ;;  %v3084_v26 = vsub.s32 2, %v3058_v17  ;;  %s3150_s8 = scalar_lea.vmem [#allocation4], %s3055_s19 }
  0x7f   : > { %v3063_v18 = vld [vmem:[%s3060_s26] sm:$0x77]  ;;  %v3066_v19 = vld [vmem:[%s3060_s26 + $0x14] sm:$0x77]  ;;  %v3072_v21 = vld [vmem:[%s3060_s26 + $0x28] sm:$0x77] }
  0x80   : > { %v778_v23 = vrot.slane %v3063_v18, %v3069_v20  ;;  %v861_v24 = vrot.slane %v3066_v19, %v3069_v20  ;;  %v979_v25 = vrot.slane %v3072_v21, %v3069_v20  ;;  %v727_v27 = vld [vmem:[%s3087_s21] sm:$0x7f]  ;;  %v732_v28 = vld [vmem:[%s3087_s21 + $0x28] sm:$0x7f]  ;;  %v1139_v29 = vrot.slane %v3063_v18, %v3075_v22  ;;  %v737_v32 = vld [vmem:[%s3087_s21 + $0x50] sm:$0x7f] }
  0x81   : > { %v1254_v30 = vrot.slane %v3066_v19, %v3075_v22  ;;  %v1369_v31 = vrot.slane %v3072_v21, %v3075_v22  ;;  %v1529_v36 = vrot.slane %v3063_v18, %v3084_v26  ;;  %v742_v37 = vld [vmem:[%s3087_s21 + $0x78] sm:$0x7f]  ;;  %v747_v38 = vld [vmem:[%s3087_s21 + $0xa0] sm:$0x7f]  ;;  %v752_v39 = vld [vmem:[%s3087_s21 + $0xc8] sm:$0x7f]  ;;  %v1644_v43 = vrot.slane %v3066_v19, %v3084_v26 }
  0x82   : > { %v803_v33 = vrot.slane %v778_v23, %v3069_v20  ;;  %v886_v34 = vrot.slane %v861_v24, %v3069_v20  ;;  %v1004_v35 = vrot.slane %v979_v25, %v3069_v20  ;;  %v1164_v40 = vrot.slane %v1139_v29, %v3075_v22  ;;  %v757_v44 = vld [vmem:[%s3087_s21 + $0xf0] sm:$0x7f]  ;;  %v762_v45 = vld [vmem:[%s3087_s21 + $0x118] sm:$0x7f]  ;;  %v767_v58 = vld [vmem:[%s3087_s21 + $0x140] sm:$0x7f] }
  0x83   : > { %v3108_v41 = vrot.slane %v1254_v30, %v3075_v22  ;;  %v3111_v42 = vrot.slane %v1369_v31, %v3075_v22  ;;  %v1091_v3 = vld [vmem:[%s3119_s23] sm:$0x7f]  ;;  %v1096_v8 = vld [vmem:[%s3119_s23 + $0x28] sm:$0x7f]  ;;  %v1101_v13 = vld [vmem:[%s3119_s23 + $0x50] sm:$0x7f] }
  0x84   : > { %v820_v46 = vmul.f32 %v803_v33, %v727_v27  ;;  %v825_v47 = vmul.f32 %v803_v33, %v732_v28  ;;  %v830_v48 = vmul.f32 %v803_v33, %v737_v32  ;;  %v835_v49 = vmul.f32 %v803_v33, %v742_v37  ;;  %v1106_v14 = vld [vmem:[%s3119_s23 + $0x78] sm:$0x7f]  ;;  %v1111_v15 = vld [vmem:[%s3119_s23 + $0xa0] sm:$0x7f]  ;;  %v1116_v25 = vld [vmem:[%s3119_s23 + $0xc8] sm:$0x7f] }
  0x85   : > { %v840_v50 = vmul.f32 %v803_v33, %v747_v38  ;;  %v845_v51 = vmul.f32 %v803_v33, %v752_v39  ;;  %v850_v52 = vmul.f32 %v803_v33, %v757_v44  ;;  %v903_v53 = vmul.f32 %v886_v34, %v732_v28  ;;  %v1121_v27 = vld [vmem:[%s3119_s23 + $0xf0] sm:$0x7f]  ;;  %s4285_s27 = smov (!%p3139_p10, %s707_s27), 14  ;;  %s2603_s15 = smul.u32 280, %s3052_s29 }
  0x86   : > { %v908_v54 = vmul.f32 %v886_v34, %v737_v32  ;;  %v913_v55 = vmul.f32 %v886_v34, %v742_v37  ;;  %v918_v56 = vmul.f32 %v886_v34, %v747_v38  ;;  %v923_v57 = vmul.f32 %v886_v34, %v752_v39  ;;  %s3177_s11 = scalar_lea.vmem %s4193_s4, %s4285_s27  ;;  %s3182_s14 = scalar_lea.vmem %s4194_s5, %s4285_s27 }
  0x87   : > { %v928_v59 = vmul.f32 %v886_v34, %v757_v44  ;;  %v933_v60 = vmul.f32 %v886_v34, %v762_v45  ;;  %v938_v61 = vadd.f32 %v903_v53, %v820_v46  ;;  %v1021_v62 = vmul.f32 %v1004_v35, %v737_v32  ;;  %s3514_s16 = scalar_lea.vmem [#allocation6], %s2603_s15  ;;  %s2596_s17 = smul.u32 (%p2734_p5), 40, %s2715_s24 }
  0x88   : > { %v943_v63 = vadd.f32 %v908_v54, %v825_v47  ;;  %v948_v0 = vadd.f32 %v913_v55, %v830_v48  ;;  %v953_v1 = vadd.f32 %v918_v56, %v835_v49  ;;  %v958_v2 = vadd.f32 %v923_v57, %v840_v50 }
  0x89   : > { %v963_v4 = vadd.f32 %v928_v59, %v845_v51  ;;  %v968_v5 = vadd.f32 %v933_v60, %v850_v52  ;;  %v1026_v6 = vmul.f32 %v1004_v35, %v742_v37  ;;  %v1031_v7 = vmul.f32 %v1004_v35, %v747_v38  ;;  %s4113_s29 = scalar_lea.vmem (%p2734_p5), %s4195_s6, %s2596_s17 }
  0x8a   : > { %v1036_v9 = vmul.f32 %v1004_v35, %v752_v39  ;;  %v1041_v10 = vmul.f32 %v1004_v35, %v757_v44  ;;  %v1046_v11 = vmul.f32 %v1004_v35, %v762_v45  ;;  %v1051_v12 = vmul.f32 %v1004_v35, %v767_v58  ;;  %v1126_v35 = vld [vmem:[%s3119_s23 + $0x118] sm:$0x7f]  ;;  %v1131_v58 = vld [vmem:[%s3119_s23 + $0x140] sm:$0x7f] }
  0x8b   : > { %v1056_v16 = vadd.f32 %v1021_v62, %v938_v61  ;;  %v1061_v23 = vadd.f32 %v1026_v6, %v943_v63  ;;  %v1066_v24 = vadd.f32 %v1031_v7, %v948_v0  ;;  %v1181_v28 = vmul.f32 %v1164_v40, %v1091_v3  ;;  %v1481_v6 = vld [vmem:[%s3150_s8] sm:$0x7f]  ;;  %v1486_v7 = vld [vmem:[%s3150_s8 + $0x28] sm:$0x7f] }
  0x8c   : > { %v1071_v29 = vadd.f32 %v1036_v9, %v953_v1  ;;  %v1076_v30 = vadd.f32 %v1041_v10, %v958_v2  ;;  %v1081_v31 = vadd.f32 %v1046_v11, %v963_v4  ;;  %v1086_v32 = vadd.f32 %v1051_v12, %v968_v5  ;;  %v1496_v12 = vld [vmem:[%s3150_s8 + $0x78] sm:$0x7f] }
  0x8d   : > { %v1186_v33 = vmul.f32 %v1164_v40, %v1096_v8  ;;  %v1191_v34 = vmul.f32 %v1164_v40, %v1101_v13  ;;  %v1196_v37 = vmul.f32 %v1164_v40, %v1106_v14  ;;  %v1201_v38 = vmul.f32 %v1164_v40, %v1111_v15 }
  0x8e   : > { %v1206_v39 = vmul.f32 %v1164_v40, %v1116_v25  ;;  %v1211_v44 = vmul.f32 %v1164_v40, %v1121_v27  ;;  %v1216_v45 = vadd.f32 %v1181_v28, %v1056_v16  ;;  %v1296_v46 = vmul.f32 %v3108_v41, %v1096_v8  ;;  %v1491_v8 = vld [vmem:[%s3150_s8 + $0x50] sm:$0x7f] }
  0x8f   : > { %v1221_v47 = vadd.f32 %v1186_v33, %v1061_v23  ;;  %v1226_v48 = vadd.f32 %v1191_v34, %v1066_v24  ;;  %v1231_v49 = vadd.f32 %v1196_v37, %v1071_v29  ;;  %v1236_v50 = vadd.f32 %v1201_v38, %v1076_v30  ;;  %v1516_v37 = vld [vmem:[%s3150_s8 + $0x118] sm:$0x7f] }
  0x90   : > { %v1241_v51 = vadd.f32 %v1206_v39, %v1081_v31  ;;  %v1246_v52 = vadd.f32 %v1211_v44, %v1086_v32  ;;  %v1301_v53 = vmul.f32 %v3108_v41, %v1101_v13  ;;  %v1306_v54 = vmul.f32 %v3108_v41, %v1106_v14 }
  0x91   : > { %v1311_v55 = vmul.f32 %v3108_v41, %v1111_v15  ;;  %v1316_v56 = vmul.f32 %v3108_v41, %v1116_v25  ;;  %v1321_v40 = vmul.f32 %v3108_v41, %v1121_v27  ;;  %v1326_v57 = vmul.f32 %v3108_v41, %v1126_v35 }
  0x92   : > { %v1331_v59 = vadd.f32 %v1296_v46, %v1216_v45  ;;  %v1336_v60 = vadd.f32 %v1301_v53, %v1221_v47  ;;  %v1341_v61 = vadd.f32 %v1306_v54, %v1226_v48  ;;  %v1411_v62 = vmul.f32 %v3111_v42, %v1101_v13  ;;  %v1501_v13 = vld [vmem:[%s3150_s8 + $0xa0] sm:$0x7f] }
  0x93   : > { %v1346_v63 = vadd.f32 %v1311_v55, %v1231_v49  ;;  %v1351_v0 = vadd.f32 %v1316_v56, %v1236_v50  ;;  %v1356_v1 = vadd.f32 %v1321_v40, %v1241_v51  ;;  %v1361_v2 = vadd.f32 %v1326_v57, %v1246_v52  ;;  %v3187_v40 = vld [vmem:[%s3177_s11] sm:$0x1f] }
  0x94   : > { %v1416_v3 = vmul.f32 %v3111_v42, %v1106_v14  ;;  %v1421_v41 = vmul.f32 %v3111_v42, %v1111_v15  ;;  %v1426_v4 = vmul.f32 %v3111_v42, %v1116_v25  ;;  %v1431_v5 = vmul.f32 %v3111_v42, %v1121_v27  ;;  %v1506_v14 = vld [vmem:[%s3150_s8 + $0xc8] sm:$0x7f]  ;;  %v1511_v27 = vld [vmem:[%s3150_s8 + $0xf0] sm:$0x7f] }
  0x95   : > { %v1436_v9 = vmul.f32 %v3111_v42, %v1126_v35  ;;  %v1441_v10 = vmul.f32 %v3111_v42, %v1131_v58  ;;  %v1446_v11 = vadd.f32 %v1411_v62, %v1331_v59  ;;  %v1554_v15 = vrot.slane %v1529_v36, %v3084_v26  ;;  %v3190_v57 = vld [vmem:[%s3182_s14] sm:$0x1f] }
  0x96   : > { %v1451_v16 = vadd.f32 %v1416_v3, %v1336_v60  ;;  %v1456_v23 = vadd.f32 %v1421_v41, %v1341_v61  ;;  %v1461_v24 = vadd.f32 %v1426_v4, %v1346_v63  ;;  %v1466_v25 = vadd.f32 %v1431_v5, %v1351_v0  ;;  %v1521_v62 = vld [vmem:[%s3150_s8 + $0x140] sm:$0x7f] }
  0x97   : > { %v1471_v28 = vadd.f32 %v1436_v9, %v1356_v1  ;;  %v1476_v42 = vadd.f32 %v1441_v10, %v1361_v2  ;;  %v1571_v29 = vmul.f32 %v1554_v15, %v1481_v6  ;;  %v1576_v30 = vmul.f32 %v1554_v15, %v1486_v7 }
  0x98   : > { %v1581_v31 = vmul.f32 %v1554_v15, %v1491_v8  ;;  %v1586_v32 = vmul.f32 %v1554_v15, %v1496_v12  ;;  %v1591_v33 = vmul.f32 %v1554_v15, %v1501_v13  ;;  %v1596_v34 = vmul.f32 %v1554_v15, %v1506_v14 }
  0x99   : > { %v1601_v38 = vmul.f32 %v1554_v15, %v1511_v27  ;;  %v1606_v35 = vadd.f32 %v1571_v29, %v1446_v11  ;;  %v1611_v36 = vadd.f32 %v1576_v30, %v1451_v16  ;;  %v1669_v39 = vrot.slane %v1644_v43, %v3084_v26 }
  0x9a   : > { %v1616_v44 = vadd.f32 %v1581_v31, %v1456_v23  ;;  %v1621_v45 = vadd.f32 %v1586_v32, %v1461_v24  ;;  %v1626_v46 = vadd.f32 %v1591_v33, %v1466_v25  ;;  %v1631_v47 = vadd.f32 %v1596_v34, %v1471_v28  ;;  %v738_v34 = vld [vmem:[%s3087_s21 + $0x58] sm:$0x7f] }
  0x9b   : > { %v1636_v48 = vadd.f32 %v1601_v38, %v1476_v42  ;;  %v1686_v49 = vmul.f32 %v1669_v39, %v1486_v7  ;;  %v1691_v43 = vmul.f32 %v1669_v39, %v1491_v8  ;;  %v1696_v50 = vmul.f32 %v1669_v39, %v1496_v12 }
  0x9c   : > { %v1701_v51 = vmul.f32 %v1669_v39, %v1501_v13  ;;  %v1706_v52 = vmul.f32 %v1669_v39, %v1506_v14  ;;  %v1711_v53 = vmul.f32 %v1669_v39, %v1511_v27  ;;  %v1716_v54 = vmul.f32 %v1669_v39, %v1516_v37  ;;  %v743_v39 = vld [vmem:[%s3087_s21 + $0x80] sm:$0x7f] }
  0x9d   : > { %v1721_v55 = vadd.f32 %v1686_v49, %v1606_v35  ;;  %v1759_v56 = vrot.slane %v3072_v21, %v3084_v26  ;;  %v1726_v58 = vadd.f32 %v1691_v43, %v1611_v36  ;;  %v1731_v59 = vadd.f32 %v1696_v50, %v1616_v44  ;;  %v748_v44 = vld [vmem:[%s3087_s21 + $0xa8] sm:$0x7f] }
  0x9e   : > { %v1736_v60 = vadd.f32 %v1701_v51, %v1621_v45  ;;  %v1741_v61 = vadd.f32 %v1706_v52, %v1626_v46  ;;  %v1746_v63 = vadd.f32 %v1711_v53, %v1631_v47  ;;  %v1751_v0 = vadd.f32 %v1716_v54, %v1636_v48  ;;  %v753_v45 = vld [vmem:[%s3087_s21 + $0xd0] sm:$0x7f]  ;;  %v758_v46 = vld [vmem:[%s3087_s21 + $0xf8] sm:$0x7f] }
  0x9f   : > { %v1784_v1 = vrot.slane %v1759_v56, %v3084_v26  ;;  %v3195_v2 = vsub.s32 4, %v3058_v17  ;;  %v3199_v3 = vrot.slane %v3187_v40, %v3069_v20  ;;  %v3203_v41 = vrot.slane %v3190_v57, %v3069_v20 }
  0xa0   : > { %v3206_v4 = vsub.s32 5, %v3058_v17  ;;  %v3209_v5 = vsub.s32 6, %v3058_v17 }
  0xa1   : > { %4227 = vst [vmem:[#allocation8_spill] sm:$0xff] %v3195_v2  ;;  %4228 = vst [vmem:[#allocation9_spill] sm:$0xff] %v3203_v41  ;;  %v1801_v6 = vmul.f32 %v1784_v1, %v1491_v8  ;;  %v1806_v7 = vmul.f32 %v1784_v1, %v1496_v12  ;;  %v1811_v9 = vmul.f32 %v1784_v1, %v1501_v13 }
  0xa2   : > { %v1816_v10 = vmul.f32 %v1784_v1, %v1506_v14  ;;  %v1821_v11 = vmul.f32 %v1784_v1, %v1511_v27  ;;  %v1826_v15 = vmul.f32 %v1784_v1, %v1516_v37  ;;  %v1831_v16 = vmul.f32 %v1784_v1, %v1521_v62  ;;  %v728_v14 = vld [vmem:[%s3087_s21 + $0x8] sm:$0x7f]  ;;  %v733_v27 = vld [vmem:[%s3087_s21 + $0x30] sm:$0x7f] }
  0xa3   : > { %v782_v23 = vrot.slane %v3063_v18, %v3195_v2  ;;  %v3213_v24 = vadd.f32 %v1801_v6, %v1721_v55  ;;  %v3215_v25 = vadd.f32 %v1806_v7, %v1726_v58  ;;  %v3217_v28 = vadd.f32 %v1811_v9, %v1731_v59 }
  0xa4   : > { %v3219_v42 = vadd.f32 %v1816_v10, %v1736_v60  ;;  %v3221_v8 = vadd.f32 %v1821_v11, %v1741_v61  ;;  %v3223_v12 = vadd.f32 %v1826_v15, %v1746_v63  ;;  %v3225_v13 = vadd.f32 %v1831_v16, %v1751_v0  ;;  %v763_v63 = vld [vmem:[%s3087_s21 + $0x120] sm:$0x7f] }
  0xa5   : > { %v807_v29 = vrot.slane %v782_v23, %v3069_v20  ;;  %v1872_v30 = vsel %vm1871_vm0, %v3213_v24, 0.0  ;;  %v1873_v31 = vsel %vm1871_vm0, %v3215_v25, 0.0  ;;  %v1875_v32 = vsel %vm1871_vm0, %v3217_v28, 0.0 }
  0xa6   : > { %v1877_v33 = vsel %vm1871_vm0, %v3219_v42, 0.0  ;;  %v1874_v37 = vadd.f32 %v1873_v31, %v1872_v30  ;;  %v1879_v38 = vsel %vm1871_vm0, %v3221_v8, 0.0  ;;  %v1881_v35 = vsel %vm1871_vm0, %v3223_v12, 0.0 }
  0xa7   : > { %v1883_v36 = vsel %vm1871_vm0, %v3225_v13, 0.0  ;;  %v821_v47 = vmul.f32 %v807_v29, %v728_v14  ;;  %v826_v48 = vmul.f32 %v807_v29, %v733_v27  ;;  %v831_v49 = vmul.f32 %v807_v29, %v738_v34 }
  0xa8   : > { %v836_v43 = vmul.f32 %v807_v29, %v743_v39  ;;  %v1876_v50 = vadd.f32 %v1875_v32, %v1874_v37  ;;  %v841_v51 = vmul.f32 %v807_v29, %v748_v44  ;;  %v846_v52 = vmul.f32 %v807_v29, %v753_v45  ;;  %v768_v32 = vld [vmem:[%s3087_s21 + $0x148] sm:$0x7f] }
  0xa9   : > { %v851_v53 = vmul.f32 %v807_v29, %v758_v46  ;;  %v865_v54 = vrot.slane %v3066_v19, %v3195_v2  ;;  %v983_v55 = vrot.slane %v3072_v21, %v3195_v2  ;;  %v1143_v56 = vrot.slane %v3063_v18, %v3206_v4 }
  0xaa   : > { %v1258_v58 = vrot.slane %v3066_v19, %v3206_v4  ;;  %v1878_v59 = vadd.f32 %v1877_v33, %v1876_v50  ;;  %v1373_v60 = vrot.slane %v3072_v21, %v3206_v4  ;;  %v1533_v61 = vrot.slane %v3063_v18, %v3209_v5 }
  0xab   : > { %v1648_v62 = vrot.slane %v3066_v19, %v3209_v5  ;;  %v890_v0 = vrot.slane %v865_v54, %v3069_v20  ;;  %v1008_v1 = vrot.slane %v983_v55, %v3069_v20  ;;  %v1168_v6 = vrot.slane %v1143_v56, %v3075_v22 }
  0xac   : > { %v3268_v7 = vrot.slane %v1258_v58, %v3075_v22  ;;  %v1880_v9 = vadd.f32 %v1879_v38, %v1878_v59  ;;  %v3271_v10 = vrot.slane %v1373_v60, %v3075_v22  ;;  %v3274_v18 = vrot.slane %v1533_v61, %v3084_v26  ;;  %v1092_v61 = vld [vmem:[%s3119_s23 + $0x8] sm:$0x7f] }
  0xad   : > { %v3277_v19 = vrot.slane %v1648_v62, %v3084_v26  ;;  %v904_v11 = vmul.f32 %v890_v0, %v733_v27  ;;  %v909_v15 = vmul.f32 %v890_v0, %v738_v34  ;;  %v914_v16 = vmul.f32 %v890_v0, %v743_v39  ;;  %v1097_v62 = vld [vmem:[%s3119_s23 + $0x30] sm:$0x7f] }
  0xae   : > { %v919_v23 = vmul.f32 %v890_v0, %v748_v44  ;;  %v1882_v14 = vadd.f32 %v1881_v35, %v1880_v9  ;;  %v924_v29 = vmul.f32 %v890_v0, %v753_v45  ;;  %v929_v30 = vmul.f32 %v890_v0, %v758_v46  ;;  %v1102_v9 = vld [vmem:[%s3119_s23 + $0x58] sm:$0x7f] }
  0xaf   : > { %v934_v31 = vmul.f32 %v890_v0, %v763_v63  ;;  %v939_v33 = vadd.f32 %v904_v11, %v821_v47  ;;  %v944_v37 = vadd.f32 %v909_v15, %v826_v48  ;;  %v949_v38 = vadd.f32 %v914_v16, %v831_v49 }
  0xb0   : > { %v954_v50 = vadd.f32 %v919_v23, %v836_v43  ;;  %v1884_v54 = vadd.f32 %v1883_v36, %v1882_v14  ;;  %v959_v55 = vadd.f32 %v924_v29, %v841_v51  ;;  %v964_v56 = vadd.f32 %v929_v30, %v846_v52  ;;  %v1107_v43 = vld [vmem:[%s3119_s23 + $0x80] sm:$0x7f] }
  0xb1   : > { %v969_v27 = vadd.f32 %v934_v31, %v851_v53  ;;  %v1022_v58 = vmul.f32 %v1008_v1, %v738_v34  ;;  %v1027_v59 = vmul.f32 %v1008_v1, %v743_v39  ;;  %v1032_v35 = vmul.f32 %v1008_v1, %v748_v44  ;;  %v1112_v34 = vld [vmem:[%s3119_s23 + $0xa8] sm:$0x7f]  ;;  %v1117_v53 = vld [vmem:[%s3119_s23 + $0xd0] sm:$0x7f]  ;;  %v1122_v39 = vld [vmem:[%s3119_s23 + $0xf8] sm:$0x7f] }
  0xb2   : > { %v1037_v60 = vmul.f32 %v1008_v1, %v753_v45  ;;  %v1885_v0 = vrot.slane %v1884_v54, 4  ;;  %v1042_v47 = vmul.f32 %v1008_v1, %v758_v46  ;;  %v1047_v48 = vmul.f32 %v1008_v1, %v763_v63 }
  0xb3   : > { %v1052_v49 = vmul.f32 %v1008_v1, %v768_v32  ;;  %v1057_v11 = vadd.f32 %v1022_v58, %v939_v33  ;;  %v1062_v36 = vadd.f32 %v1027_v59, %v944_v37  ;;  %v1067_v51 = vadd.f32 %v1032_v35, %v949_v38  ;;  %v1127_v32 = vld [vmem:[%s3119_s23 + $0x120] sm:$0x7f] }
  0xb4   : > { %v1072_v52 = vadd.f32 %v1037_v60, %v954_v50  ;;  %v1886_v15 = vadd.f32 %v1885_v0, %v1884_v54  ;;  %v1077_v44 = vadd.f32 %v1042_v47, %v959_v55  ;;  %v1082_v16 = vadd.f32 %v1047_v48, %v964_v56  ;;  %v1132_v48 = vld [vmem:[%s3119_s23 + $0x148] sm:$0x7f] }
  0xb5   : > { %v1087_v45 = vadd.f32 %v1052_v49, %v969_v27  ;;  %v1182_v23 = vmul.f32 %v1168_v6, %v1092_v61  ;;  %v1187_v14 = vmul.f32 %v1168_v6, %v1097_v62  ;;  %v1192_v29 = vmul.f32 %v1168_v6, %v1102_v9 }
  0xb6   : > { %v1197_v46 = vmul.f32 %v1168_v6, %v1107_v43  ;;  %v1887_v63 = vrot.slane %v1886_v15, 2  ;;  %v1202_v1 = vmul.f32 %v1168_v6, %v1112_v34  ;;  %v1207_v30 = vmul.f32 %v1168_v6, %v1117_v53 }
  0xb7   : > { %v1212_v31 = vmul.f32 %v1168_v6, %v1122_v39  ;;  %v1217_v33 = vadd.f32 %v1182_v23, %v1057_v11  ;;  %v1222_v37 = vadd.f32 %v1187_v14, %v1062_v36  ;;  %v1227_v38 = vadd.f32 %v1192_v29, %v1067_v51 }
  0xb8   : > { %v1232_v50 = vadd.f32 %v1197_v46, %v1072_v52  ;;  %v1888_v58 = vadd.f32 %v1887_v63, %v1886_v15  ;;  %v1237_v59 = vadd.f32 %v1202_v1, %v1077_v44  ;;  %v1242_v54 = vadd.f32 %v1207_v30, %v1082_v16 }
  0xb9   : > { %v1247_v55 = vadd.f32 %v1212_v31, %v1087_v45  ;;  %v1297_v56 = vmul.f32 %v3268_v7, %v1097_v62  ;;  %v1302_v27 = vmul.f32 %v3268_v7, %v1102_v9  ;;  %v1307_v35 = vmul.f32 %v3268_v7, %v1107_v43 }
  0xba   : > { %v1312_v60 = vmul.f32 %v3268_v7, %v1112_v34  ;;  %v1889_v61 = vrot.slane %v1888_v58, 1  ;;  %v1317_v6 = vmul.f32 %v3268_v7, %v1117_v53  ;;  %v1322_v0 = vmul.f32 %v3268_v7, %v1122_v39 }
  0xbb   : > { %v1327_v47 = vmul.f32 %v3268_v7, %v1127_v32  ;;  %v1332_v49 = vadd.f32 %v1297_v56, %v1217_v33  ;;  %v1337_v11 = vadd.f32 %v1302_v27, %v1222_v37  ;;  %v1342_v36 = vadd.f32 %v1307_v35, %v1227_v38  ;;  %v1482_v37 = vld [vmem:[%s3150_s8 + $0x8] sm:$0x7f] }
  0xbc   : > { %v1347_v51 = vadd.f32 %v1312_v60, %v1232_v50  ;;  %v1890_v52 = vadd.f32 %v1889_v61, %v1888_v58  ;;  %v1352_v62 = vadd.f32 %v1317_v6, %v1237_v59  ;;  %v1357_v15 = vadd.f32 %v1322_v0, %v1242_v54  ;;  %v3341_v59 = vld [vmem:[%s3150_s8 + $0x58] sm:$0x7f]  ;;  %v3344_v54 = vld [vmem:[%s3150_s8 + $0x80] sm:$0x7f]  ;;  %v1507_v61 = vld [vmem:[%s3150_s8 + $0xd0] sm:$0x7f] }
  0xbd   : > { %v1362_v44 = vadd.f32 %v1327_v47, %v1247_v55  ;;  %v1412_v16 = vmul.f32 %v3271_v10, %v1102_v9  ;;  %v1417_v45 = vmul.f32 %v3271_v10, %v1107_v43  ;;  %v1422_v23 = vmul.f32 %v3271_v10, %v1112_v34  ;;  %v3347_v55 = vld [vmem:[%s3150_s8 + $0xa8] sm:$0x7f] }
  0xbe   : > { %v1427_v14 = vmul.f32 %v3271_v10, %v1117_v53  ;;  %v1968_v29 = vmul.f32 0.020408163, %v1890_v52  ;;  %v1432_v7 = vmul.f32 %v3271_v10, %v1122_v39  ;;  %v1437_v46 = vmul.f32 %v3271_v10, %v1127_v32 }
  0xbf   : > { %v1442_v63 = vmul.f32 %v3271_v10, %v1132_v48  ;;  %v1447_v1 = vadd.f32 %v1412_v16, %v1332_v49  ;;  %v1452_v30 = vadd.f32 %v1417_v45, %v1337_v11  ;;  %v1457_v31 = vadd.f32 %v1422_v23, %v1342_v36  ;;  %v1512_v49 = vld [vmem:[%s3150_s8 + $0xf8] sm:$0x7f] }
  0xc0   : > { %v1462_v33 = vadd.f32 %v1427_v14, %v1347_v51  ;;  %v3304_v9 = vsub.f32 %v3213_v24, %v1968_v29  ;;  %v3307_v43 = vsub.f32 %v3215_v25, %v1968_v29  ;;  %v3310_v34 = vsub.f32 %v3217_v28, %v1968_v29 }
  0xc1   : > { %v3313_v53 = vsub.f32 %v3219_v42, %v1968_v29  ;;  %v3316_v10 = vsub.f32 %v3221_v8, %v1968_v29  ;;  %v3319_v39 = vsub.f32 %v3223_v12, %v1968_v29  ;;  %v3322_v24 = vsub.f32 %v3225_v13, %v1968_v29  ;;  %v1487_v12 = vld [vmem:[%s3150_s8 + $0x30] sm:$0x7f] }
  0xc2   : > { %4229 = vst [vmem:[#allocation10_spill] sm:$0xff] %v3307_v43  ;;  %4230 = vst [vmem:[#allocation11_spill] sm:$0xff] %v3310_v34  ;;  %v1467_v25 = vadd.f32 %v1432_v7, %v1352_v62  ;;  %v2008_v28 = vmul.f32 %v3304_v9, %v3304_v9  ;;  %v2013_v32 = vmul.f32 %v3307_v43, %v3307_v43 }
  0xc3   : > { %4231 = vst [vmem:[#allocation12_spill] sm:$0xff] %v3313_v53  ;;  %4232 = vst [vmem:[#allocation13_spill] sm:$0xff] %v3316_v10  ;;  %v2018_v42 = vmul.f32 %v3310_v34, %v3310_v34  ;;  %v2023_v8 = vmul.f32 %v3313_v53, %v3313_v53  ;;  %v2028_v13 = vmul.f32 %v3316_v10, %v3316_v10  ;;  %v769_v34 = vld [vmem:[%s3087_s21 + $0x150] sm:$0x7f] }
  0xc4   : > { %4233 = vst [vmem:[#allocation14_spill] sm:$0xff] %v3319_v39  ;;  %4234 = vst [vmem:[#allocation15_spill] sm:$0xff] %v3322_v24  ;;  %v2033_v38 = vmul.f32 %v3319_v39, %v3319_v39  ;;  %v2038_v50 = vmul.f32 %v3322_v24, %v3322_v24  ;;  %v1472_v58 = vadd.f32 %v1437_v46, %v1357_v15  ;;  %v2043_v56 = vsel %vm1871_vm0, %v2008_v28, 0.0  ;;  %v1517_v46 = vld [vmem:[%s3150_s8 + $0x120] sm:$0x7f] }
  0xc5   : > { %v2044_v27 = vsel %vm1871_vm0, %v2013_v32, 0.0  ;;  %v2046_v35 = vsel %vm1871_vm0, %v2018_v42, 0.0  ;;  %v2048_v60 = vsel %vm1871_vm0, %v2023_v8, 0.0  ;;  %v2050_v0 = vsel %vm1871_vm0, %v2028_v13, 0.0  ;;  %v3382_v13 = vld [vmem:[%s3060_s26 + $0x1c] sm:$0x77] }
  0xc6   : > { %v2045_v6 = vadd.f32 %v2044_v27, %v2043_v56  ;;  %v2052_v47 = vsel %vm1871_vm0, %v2033_v38, 0.0  ;;  %v2054_v48 = vsel %vm1871_vm0, %v2038_v50, 0.0  ;;  %v1477_v11 = vadd.f32 %v1442_v63, %v1362_v44  ;;  %v3386_v56 = vld [vmem:[%s3060_s26 + $0x30] sm:$0x77] }
  0xc7   : > { %v1572_v36 = vmul.f32 %v3274_v18, %v1482_v37  ;;  %v1577_v51 = vmul.f32 %v3274_v18, %v1487_v12  ;;  %v1582_v52 = vmul.f32 %v3274_v18, %v3341_v59  ;;  %v1587_v15 = vmul.f32 %v3274_v18, %v3344_v54 }
  0xc8   : > { %v2047_v62 = vadd.f32 %v2046_v35, %v2045_v6  ;;  %v1592_v16 = vmul.f32 %v3274_v18, %v3347_v55  ;;  %v1597_v45 = vmul.f32 %v3274_v18, %v1507_v61  ;;  %v1602_v23 = vmul.f32 %v3274_v18, %v1512_v49 }
  0xc9   : > { %v1607_v14 = vadd.f32 %v1572_v36, %v1447_v1  ;;  %v1612_v44 = vadd.f32 %v1577_v51, %v1452_v30  ;;  %v1617_v29 = vadd.f32 %v1582_v52, %v1457_v31  ;;  %v1622_v63 = vadd.f32 %v1587_v15, %v1462_v33  ;;  %v1522_v15 = vld [vmem:[%s3150_s8 + $0x148] sm:$0x7f] }
  0xca   : > { %v2049_v7 = vadd.f32 %v2048_v60, %v2047_v62  ;;  %v1627_v28 = vadd.f32 %v1592_v16, %v1467_v25  ;;  %v1632_v32 = vadd.f32 %v1597_v45, %v1472_v58  ;;  %v1637_v42 = vadd.f32 %v1602_v23, %v1477_v11  ;;  %v3379_v25 = vld [vmem:[%s3060_s26 + $0x8] sm:$0x77] }
  0xcb   : > { %v1687_v8 = vmul.f32 %v3277_v19, %v1487_v12  ;;  %v1692_v37 = vmul.f32 %v3277_v19, %v3341_v59  ;;  %v1697_v18 = vmul.f32 %v3277_v19, %v3344_v54  ;;  %v1702_v30 = vmul.f32 %v3277_v19, %v3347_v55 }
  0xcc   : > { %v2051_v1 = vadd.f32 %v2050_v0, %v2049_v7  ;;  %v1707_v31 = vmul.f32 %v3277_v19, %v1507_v61  ;;  %v1712_v33 = vmul.f32 %v3277_v19, %v1512_v49  ;;  %v1717_v12 = vmul.f32 %v3277_v19, %v1517_v46 }
  0xcd   : > { %v1722_v38 = vadd.f32 %v1687_v8, %v1607_v14  ;;  %v1727_v50 = vadd.f32 %v1692_v37, %v1612_v44  ;;  %v1732_v58 = vadd.f32 %v1697_v18, %v1617_v29  ;;  %v1737_v35 = vadd.f32 %v1702_v30, %v1622_v63 }
  0xce   : > { %v2053_v27 = vadd.f32 %v2052_v47, %v2051_v1  ;;  %v1742_v60 = vadd.f32 %v1707_v31, %v1627_v28  ;;  %v1747_v6 = vadd.f32 %v1712_v33, %v1632_v32  ;;  %v1752_v0 = vadd.f32 %v1717_v12, %v1637_v42 }
  0xcf   : > { %v1763_v11 = vrot.slane %v3072_v21, %v3209_v5  ;;  %v786_v36 = vrot.slane %v3379_v25, %v3069_v20  ;;  %v869_v19 = vrot.slane %v3382_v13, %v3069_v20  ;;  %v987_v52 = vrot.slane %v3386_v56, %v3069_v20 }
  0xd0   : > { %v2055_v51 = vadd.f32 %v2054_v48, %v2053_v27  ;;  %v1147_v47 = vrot.slane %v3379_v25, %v3075_v22  ;;  %v1262_v62 = vrot.slane %v3382_v13, %v3075_v22 }
  0xd1   : > { %v1788_v16 = vrot.slane %v1763_v11, %v3084_v26  ;;  %v811_v21 = vrot.slane %v786_v36, %v3069_v20  ;;  %v894_v45 = vrot.slane %v869_v19, %v3069_v20  ;;  %v3407_v14 = vrot.slane %v987_v52, %v3069_v20  ;;  %v744_v11 = vld [vmem:[%s3087_s21 + $0x88] sm:$0x7f]  ;;  %v749_v19 = vld [vmem:[%s3087_s21 + $0xb0] sm:$0x7f] }
  0xd2   : > { %v2056_v48 = vrot.slane %v2055_v51, 4  ;;  %v3410_v44 = vrot.slane %v1147_v47, %v3075_v22  ;;  %v3413_v29 = vrot.slane %v1262_v62, %v3075_v22 }
  0xd3   : > { %v1802_v7 = vmul.f32 %v1788_v16, %v3341_v59  ;;  %v1807_v63 = vmul.f32 %v1788_v16, %v3344_v54  ;;  %v1812_v28 = vmul.f32 %v1788_v16, %v3347_v55  ;;  %v1817_v32 = vmul.f32 %v1788_v16, %v1507_v61 }
  0xd4   : > { %v2057_v42 = vadd.f32 %v2056_v48, %v2055_v51  ;;  %v1822_v8 = vmul.f32 %v1788_v16, %v1512_v49  ;;  %v1827_v37 = vmul.f32 %v1788_v16, %v1517_v46  ;;  %v1832_v18 = vmul.f32 %v1788_v16, %v1522_v15  ;;  %v729_v49 = vld [vmem:[%s3087_s21 + $0x10] sm:$0x7f]  ;;  %v734_v46 = vld [vmem:[%s3087_s21 + $0x38] sm:$0x7f]  ;;  %v759_v48 = vld [vmem:[%s3087_s21 + $0x100] sm:$0x7f] }
  0xd5   : > { %v3418_v1 = vadd.f32 %v1802_v7, %v1722_v38  ;;  %v3420_v30 = vadd.f32 %v1807_v63, %v1727_v50  ;;  %v3422_v31 = vadd.f32 %v1812_v28, %v1732_v58  ;;  %v3424_v33 = vadd.f32 %v1817_v32, %v1737_v35  ;;  %v754_v51 = vld [vmem:[%s3087_s21 + $0xd8] sm:$0x7f]  ;;  %v764_v7 = vld [vmem:[%s3087_s21 + $0x128] sm:$0x7f] }
  0xd6   : > { %v2058_v59 = vrot.slane %v2057_v42, 2  ;;  %v3426_v54 = vadd.f32 %v1822_v8, %v1742_v60  ;;  %v3428_v55 = vadd.f32 %v1827_v37, %v1747_v6  ;;  %v3430_v61 = vadd.f32 %v1832_v18, %v1752_v0  ;;  %v739_v0 = vld [vmem:[%s3087_s21 + $0x60] sm:$0x7f] }
  0xd7   : > { %v1891_v12 = vsel %vm1871_vm0, %v3418_v1, 0.0  ;;  %v1892_v38 = vsel %vm1871_vm0, %v3420_v30, 0.0  ;;  %v1894_v50 = vsel %vm1871_vm0, %v3422_v31, 0.0  ;;  %v1896_v58 = vsel %vm1871_vm0, %v3424_v33, 0.0 }
  0xd8   : > { %v2059_v27 = vadd.f32 %v2058_v59, %v2057_v42  ;;  %v1893_v35 = vadd.f32 %v1892_v38, %v1891_v12  ;;  %v1898_v60 = vsel %vm1871_vm0, %v3426_v54, 0.0  ;;  %v1900_v6 = vsel %vm1871_vm0, %v3428_v55, 0.0 }
  0xd9   : > { %v1902_v36 = vsel %vm1871_vm0, %v3430_v61, 0.0  ;;  %v822_v52 = vmul.f32 %v811_v21, %v729_v49  ;;  %v827_v47 = vmul.f32 %v811_v21, %v734_v46  ;;  %v832_v62 = vmul.f32 %v811_v21, %v739_v0 }
  0xda   : > { %v2060_v15 = vrot.slane %v2059_v27, 1  ;;  %v1895_v16 = vadd.f32 %v1894_v50, %v1893_v35  ;;  %v837_v63 = vmul.f32 %v811_v21, %v744_v11  ;;  %v842_v28 = vmul.f32 %v811_v21, %v749_v19 }
  0xdb   : > { %v847_v32 = vmul.f32 %v811_v21, %v754_v51  ;;  %v852_v42 = vmul.f32 %v811_v21, %v759_v48  ;;  %v905_v8 = vmul.f32 %v894_v45, %v734_v46  ;;  %v910_v37 = vmul.f32 %v894_v45, %v739_v0 }
  0xdc   : > { %v2061_v18 = vadd.f32 %v2060_v15, %v2059_v27  ;;  %v1897_v59 = vadd.f32 %v1896_v58, %v1895_v16  ;;  %v915_v12 = vmul.f32 %v894_v45, %v744_v11  ;;  %v920_v38 = vmul.f32 %v894_v45, %v749_v19  ;;  %v1108_v16 = vld [vmem:[%s3119_s23 + $0x88] sm:$0x7f] }
  0xdd   : > { %v925_v23 = vmul.f32 %v894_v45, %v754_v51  ;;  %v930_v24 = vmul.f32 %v894_v45, %v759_v48  ;;  %v935_v49 = vmul.f32 %v894_v45, %v764_v7  ;;  %v940_v39 = vadd.f32 %v905_v8, %v822_v52 }
  0xde   : > { %v2138_v10 = vmul.f32 0.020408163, %v2061_v18  ;;  %v1899_v53 = vadd.f32 %v1898_v60, %v1897_v59  ;;  %v945_v50 = vadd.f32 %v910_v37, %v827_v47  ;;  %v950_v35 = vadd.f32 %v915_v12, %v832_v62  ;;  %v1098_v62 = vld [vmem:[%s3119_s23 + $0x38] sm:$0x7f]  ;;  %v1128_v12 = vld [vmem:[%s3119_s23 + $0x128] sm:$0x7f] }
  0xdf   : > { %v955_v43 = vadd.f32 %v920_v38, %v837_v63  ;;  %v960_v17 = vadd.f32 %v925_v23, %v842_v28  ;;  %v965_v21 = vadd.f32 %v930_v24, %v847_v32  ;;  %v970_v46 = vadd.f32 %v935_v49, %v852_v42  ;;  %v1093_v23 = vld [vmem:[%s3119_s23 + $0x10] sm:$0x7f]  ;;  %v1118_v32 = vld [vmem:[%s3119_s23 + $0xd8] sm:$0x7f] }
  0xe0   : > { %v2143_v58 = vadd.f32 0.001, %v2138_v10  ;;  %v1901_v27 = vadd.f32 %v1900_v6, %v1899_v53  ;;  %v1023_v15 = vmul.f32 %v3407_v14, %v739_v0  ;;  %v1028_v45 = vmul.f32 %v3407_v14, %v744_v11  ;;  %v1103_v0 = vld [vmem:[%s3119_s23 + $0x60] sm:$0x7f]  ;;  %v1113_v11 = vld [vmem:[%s3119_s23 + $0xb0] sm:$0x7f] }
  0xe1   : > { %v1033_v60 = vmul.f32 %v3407_v14, %v749_v19  ;;  %v1038_v52 = vmul.f32 %v3407_v14, %v754_v51  ;;  %v1043_v47 = vmul.f32 %v3407_v14, %v759_v48  ;;  %v1048_v24 = vmul.f32 %v3407_v14, %v764_v7  ;;  %v1123_v48 = vld [vmem:[%s3119_s23 + $0x100] sm:$0x7f] }
  0xe2   : > { %2628 = vrsqrt.f32 %v2143_v58  ;;  %v1903_v10 = vadd.f32 %v1902_v36, %v1901_v27  ;;  %v1053_v53 = vmul.f32 %v3407_v14, %v769_v34  ;;  %v1058_v6 = vadd.f32 %v1023_v15, %v940_v39 }
  0xe3   : > { %v1063_v63 = vadd.f32 %v1028_v45, %v945_v50  ;;  %v1068_v19 = vadd.f32 %v1033_v60, %v950_v35  ;;  %v1073_v28 = vadd.f32 %v1038_v52, %v955_v43  ;;  %v1078_v51 = vadd.f32 %v1043_v47, %v960_v17 }
  0xe4   : > { %v1904_v42 = vrot.slane %v1903_v10, 4  ;;  %v1083_v8 = vadd.f32 %v1048_v24, %v965_v21  ;;  %v1088_v7 = vadd.f32 %v1053_v53, %v970_v46  ;;  %v1183_v37 = vmul.f32 %v3410_v44, %v1093_v23 }
  0xe5   : > { %v1188_v36 = vmul.f32 %v3410_v44, %v1098_v62  ;;  %v1193_v34 = vmul.f32 %v3410_v44, %v1103_v0  ;;  %v1198_v39 = vmul.f32 %v3410_v44, %v1108_v16  ;;  %v1203_v14 = vmul.f32 %v3410_v44, %v1113_v11 }
  0xe6   : > { %v1905_v18 = vadd.f32 %v1904_v42, %v1903_v10  ;;  %v1208_v43 = vmul.f32 %v3410_v44, %v1118_v32  ;;  %v1213_v17 = vmul.f32 %v3410_v44, %v1123_v48  ;;  %v1218_v59 = vadd.f32 %v1183_v37, %v1058_v6 }
  0xe7   : > { %v1223_v38 = vadd.f32 %v1188_v36, %v1063_v63  ;;  %v1228_v49 = vadd.f32 %v1193_v34, %v1068_v19  ;;  %v1233_v50 = vadd.f32 %v1198_v39, %v1073_v28  ;;  %v1238_v35 = vadd.f32 %v1203_v14, %v1078_v51 }
  0xe8   : > { %v1906_v21 = vrot.slane %v1905_v18, 2  ;;  %v1243_v46 = vadd.f32 %v1208_v43, %v1083_v8  ;;  %v1248_v58 = vadd.f32 %v1213_v17, %v1088_v7  ;;  %v1298_v27 = vmul.f32 %v3413_v29, %v1098_v62 }
  0xe9   : > { %v1303_v15 = vmul.f32 %v3413_v29, %v1103_v0  ;;  %v1308_v45 = vmul.f32 %v3413_v29, %v1108_v16  ;;  %v1313_v60 = vmul.f32 %v3413_v29, %v1113_v11  ;;  %v1318_v44 = vmul.f32 %v3413_v29, %v1118_v32 }
  0xea   : > { %v1907_v52 = vadd.f32 %v1906_v21, %v1905_v18  ;;  %v1323_v47 = vmul.f32 %v3413_v29, %v1123_v48  ;;  %v1328_v24 = vmul.f32 %v3413_v29, %v1128_v12  ;;  %v1333_v23 = vadd.f32 %v1298_v27, %v1218_v59  ;;  %v1133_v29 = vld [vmem:[%s3119_s23 + $0x150] sm:$0x7f] }
  0xeb   : > { %v1338_v10 = vadd.f32 %v1303_v15, %v1223_v38  ;;  %v1343_v53 = vadd.f32 %v1308_v45, %v1228_v49  ;;  %v1348_v6 = vadd.f32 %v1313_v60, %v1233_v50  ;;  %v1353_v63 = vadd.f32 %v1318_v44, %v1238_v35 }
  0xec   : > { %v3484_v62 = vpop.eup %2628  ;;  %v1908_v19 = vrot.slane %v1907_v52, 1  ;;  %v1358_v28 = vadd.f32 %v1323_v47, %v1243_v46  ;;  %v1363_v51 = vadd.f32 %v1328_v24, %v1248_v58  ;;  %v4235_v42 = vrot.slane %v3386_v56, %v3075_v22  ;;  %v1488_v47 = vld [vmem:[%s3150_s8 + $0x38] sm:$0x7f] }
  0xed   : > { %v2155_v7 = vmul.f32 %v3484_v62, %v3304_v9  ;;  %v1537_v37 = vrot.slane %v3379_v25, %v3084_v26  ;;  %v1652_v36 = vrot.slane %v3382_v13, %v3084_v26  ;;  %v1767_v34 = vrot.slane %v3386_v56, %v3084_v26 }
  0xee   : > { %v1402_v8 = vrot.slane %v4235_v42, %v3075_v22  ;;  %v1909_v39 = vadd.f32 %v1908_v19, %v1907_v52  ;;  %v1483_v52 = vld [vmem:[%s3150_s8 + $0x10] sm:$0x7f]  ;;  %v1498_v42 = vld [vmem:[%s3150_s8 + $0x88] sm:$0x7f] }
  0xef   : > { %v2216_v17 = vmul.f32 %v3199_v3, %v2155_v7 }
  0xf0   : > { %v1413_v14 = vmul.f32 %v1402_v8, %v1103_v0  ;;  %v1418_v18 = vmul.f32 %v1402_v8, %v1108_v16  ;;  %v1423_v43 = vmul.f32 %v1402_v8, %v1113_v11  ;;  %v1428_v59 = vmul.f32 %v1402_v8, %v1118_v32 }
  0xf1   : > { %v1433_v38 = vmul.f32 %v1402_v8, %v1123_v48  ;;  %v1438_v49 = vmul.f32 %v1402_v8, %v1128_v12  ;;  %v1969_v9 = vmul.f32 0.020408163, %v1909_v39  ;;  %v1443_v50 = vmul.f32 %v1402_v8, %v1133_v29  ;;  %v1503_v8 = vld [vmem:[%s3150_s8 + $0xb0] sm:$0x7f]  ;;  %v1508_v39 = vld [vmem:[%s3150_s8 + $0xd8] sm:$0x7f] }
  0xf2   : > { %v1448_v35 = vadd.f32 %v1413_v14, %v1333_v23  ;;  %v1453_v21 = vadd.f32 %v1418_v18, %v1338_v10  ;;  %v2277_v46 = vadd.f32 %v3203_v41, %v2216_v17  ;;  %v1458_v58 = vadd.f32 %v1423_v43, %v1343_v53 }
  0xf3   : > { %v1463_v27 = vadd.f32 %v1428_v59, %v1348_v6  ;;  %v1468_v15 = vadd.f32 %v1433_v38, %v1353_v63  ;;  %v3503_v45 = vsub.f32 %v3418_v1, %v1969_v9  ;;  %v3506_v0 = vsub.f32 %v3420_v30, %v1969_v9  ;;  %v1493_v6 = vld [vmem:[%s3150_s8 + $0x60] sm:$0x7f] }
  0xf4   : > { %v3509_v16 = vsub.f32 %v3422_v31, %v1969_v9  ;;  %v3512_v11 = vsub.f32 %v3424_v33, %v1969_v9  ;;  %2312 = vst [vmem:[%s3514_s16] sm:$0x7f] %v2277_v46  ;;  %v3518_v32 = vsub.f32 %v3426_v54, %v1969_v9  ;;  %v3521_v1 = vsub.f32 %v3428_v55, %v1969_v9 }
  0xf5   : > { %v3524_v30 = vsub.f32 %v3430_v61, %v1969_v9  ;;  %v1473_v31 = vadd.f32 %v1438_v49, %v1358_v28  ;;  %v2009_v33 = vmul.f32 %v3503_v45, %v3503_v45  ;;  %v2014_v48 = vmul.f32 %v3506_v0, %v3506_v0 }
  0xf6   : > { %4236 = vst [vmem:[#allocation16_spill] sm:$0xff] %v3512_v11  ;;  %4237 = vst [vmem:[#allocation17_spill] sm:$0xff] %v3518_v32  ;;  %v2019_v12 = vmul.f32 %v3509_v16, %v3509_v16  ;;  %v2024_v54 = vmul.f32 %v3512_v11, %v3512_v11  ;;  %v2029_v55 = vmul.f32 %v3518_v32, %v3518_v32 }
  0xf7   : > { %4238 = vst [vmem:[#allocation18_spill] sm:$0xff] %v3521_v1  ;;  %4239 = vst [vmem:[#allocation19_spill] sm:$0xff] %v3524_v30  ;;  %v2034_v61 = vmul.f32 %v3521_v1, %v3521_v1  ;;  %v2039_v60 = vmul.f32 %v3524_v30, %v3524_v30  ;;  %v1478_v44 = vadd.f32 %v1443_v50, %v1363_v51  ;;  %v2062_v24 = vsel %vm1871_vm0, %v2009_v33, 0.0  ;;  %v1523_v1 = vld [vmem:[%s3150_s8 + $0x150] sm:$0x7f] }
  0xf8   : > { %v2063_v23 = vsel %vm1871_vm0, %v2014_v48, 0.0  ;;  %v2065_v10 = vsel %vm1871_vm0, %v2019_v12, 0.0  ;;  %v3547_v53 = vrot.slane %v3187_v40, %v3075_v22  ;;  %v2067_v19 = vsel %vm1871_vm0, %v2024_v54, 0.0  ;;  %v1513_v40 = vld [vmem:[%s3150_s8 + $0x100] sm:$0x7f] }
  0xf9   : > { %v2064_v63 = vadd.f32 %v2063_v23, %v2062_v24  ;;  %v2069_v28 = vsel %vm1871_vm0, %v2029_v55, 0.0  ;;  %v3554_v51 = vrot.slane %v3190_v57, %v3075_v22  ;;  %v2071_v7 = vsel %vm1871_vm0, %v2034_v61, 0.0 }
  0xfa   : > { %v2073_v29 = vsel %vm1871_vm0, %v2039_v60, 0.0  ;;  %v1562_v14 = vrot.slane %v1537_v37, %v3084_v26  ;;  %v1677_v18 = vrot.slane %v1652_v36, %v3084_v26  ;;  %v1792_v17 = vrot.slane %v1767_v34, %v3084_v26  ;;  %v1518_v37 = vld [vmem:[%s3150_s8 + $0x128] sm:$0x7f] }
  0xfb   : > { %v2066_v43 = vadd.f32 %v2065_v10, %v2064_v63 }
  0xfc   : > { %v1573_v38 = vmul.f32 %v1562_v14, %v1483_v52  ;;  %v1578_v49 = vmul.f32 %v1562_v14, %v1488_v47  ;;  %v1583_v9 = vmul.f32 %v1562_v14, %v1493_v6  ;;  %v1588_v50 = vmul.f32 %v1562_v14, %v1498_v42 }
  0xfd   : > { %v2068_v46 = vadd.f32 %v2067_v19, %v2066_v43  ;;  %v1593_v33 = vmul.f32 %v1562_v14, %v1503_v8  ;;  %v1598_v48 = vmul.f32 %v1562_v14, %v1508_v39  ;;  %v1603_v12 = vmul.f32 %v1562_v14, %v1513_v40 }
  0xfe   : > { %v1608_v54 = vadd.f32 %v1573_v38, %v1448_v35  ;;  %v1613_v36 = vadd.f32 %v1578_v49, %v1453_v21  ;;  %v1618_v55 = vadd.f32 %v1583_v9, %v1458_v58  ;;  %v1623_v34 = vadd.f32 %v1588_v50, %v1463_v27 }
  0xff   : > { %v2070_v61 = vadd.f32 %v2069_v28, %v2068_v46  ;;  %v1628_v60 = vadd.f32 %v1593_v33, %v1468_v15  ;;  %v1633_v24 = vadd.f32 %v1598_v48, %v1473_v31  ;;  %v1638_v23 = vadd.f32 %v1603_v12, %v1478_v44 }
 0x100   : > { %v1688_v10 = vmul.f32 %v1677_v18, %v1488_v47  ;;  %v1693_v63 = vmul.f32 %v1677_v18, %v1493_v6  ;;  %v1698_v52 = vmul.f32 %v1677_v18, %v1498_v42  ;;  %v1703_v59 = vmul.f32 %v1677_v18, %v1503_v8 }
 0x101   : > { %v2072_v57 = vadd.f32 %v2071_v7, %v2070_v61  ;;  %v1708_v30 = vmul.f32 %v1677_v18, %v1508_v39  ;;  %v1713_v19 = vmul.f32 %v1677_v18, %v1513_v40  ;;  %v1718_v43 = vmul.f32 %v1677_v18, %v1518_v37 }
 0x102   : > { %v1723_v14 = vadd.f32 %v1688_v10, %v1608_v54  ;;  %v1728_v32 = vadd.f32 %v1693_v63, %v1613_v36  ;;  %v1733_v35 = vadd.f32 %v1698_v52, %v1618_v55  ;;  %v1738_v38 = vadd.f32 %v1703_v59, %v1623_v34  ;;  %v740_v10 = vld [vmem:[%s3087_s21 + $0x68] sm:$0x7f]  ;;  %v745_v63 = vld [vmem:[%s3087_s21 + $0x90] sm:$0x7f] }
 0x103   : > { %v2074_v21 = vadd.f32 %v2073_v29, %v2072_v57  ;;  %v1743_v58 = vadd.f32 %v1708_v30, %v1628_v60  ;;  %v1748_v27 = vadd.f32 %v1713_v19, %v1633_v24  ;;  %v1753_v28 = vadd.f32 %v1718_v43, %v1638_v23  ;;  %v750_v43 = vld [vmem:[%s3087_s21 + $0xb8] sm:$0x7f] }
 0x104   : > { %v1803_v15 = vmul.f32 %v1792_v17, %v1493_v6  ;;  %v1808_v31 = vmul.f32 %v1792_v17, %v1498_v42  ;;  %v1813_v44 = vmul.f32 %v1792_v17, %v1503_v8  ;;  %v1818_v47 = vmul.f32 %v1792_v17, %v1508_v39 }
 0x105   : > { %v2075_v49 = vrot.slane %v2074_v21, 4  ;;  %v1823_v9 = vmul.f32 %v1792_v17, %v1513_v40  ;;  %v1828_v7 = vmul.f32 %v1792_v17, %v1518_v37  ;;  %v1833_v50 = vmul.f32 %v1792_v17, %v1523_v1  ;;  %v730_v40 = vld [vmem:[%s3087_s21 + $0x18] sm:$0x7f]  ;;  %v735_v37 = vld [vmem:[%s3087_s21 + $0x40] sm:$0x7f] }
 0x106   : > { %v3571_v46 = vadd.f32 %v1803_v15, %v1723_v14  ;;  %v3573_v18 = vadd.f32 %v1808_v31, %v1728_v32  ;;  %v3575_v33 = vadd.f32 %v1813_v44, %v1733_v35  ;;  %v3577_v29 = vadd.f32 %v1818_v47, %v1738_v38  ;;  %v755_v14 = vld [vmem:[%s3087_s21 + $0xe0] sm:$0x7f]  ;;  %v760_v15 = vld [vmem:[%s3087_s21 + $0x108] sm:$0x7f]  ;;  %v765_v31 = vld [vmem:[%s3087_s21 + $0x130] sm:$0x7f] }
 0x107   : > { %v2076_v30 = vadd.f32 %v2075_v49, %v2074_v21  ;;  %v3579_v57 = vadd.f32 %v1823_v9, %v1743_v58  ;;  %v3581_v6 = vadd.f32 %v1828_v7, %v1748_v27  ;;  %v3583_v42 = vadd.f32 %v1833_v50, %v1753_v28 }
 0x108   : > { %v1910_v8 = vsel %vm1871_vm0, %v3571_v46, 0.0  ;;  %v1911_v32 = vsel %vm1871_vm0, %v3573_v18, 0.0  ;;  %v1913_v1 = vsel %vm1871_vm0, %v3575_v33, 0.0  ;;  %v1915_v39 = vsel %vm1871_vm0, %v3577_v29, 0.0 }
 0x109   : > { %v2077_v17 = vrot.slane %v2076_v30, 2  ;;  %v1912_v59 = vadd.f32 %v1911_v32, %v1910_v8  ;;  %v1917_v48 = vsel %vm1871_vm0, %v3579_v57, 0.0  ;;  %v1919_v12 = vsel %vm1871_vm0, %v3581_v6, 0.0 }
 0x10a   : > { %v1921_v54 = vsel %vm1871_vm0, %v3583_v42, 0.0  ;;  %v4240_v36 = vrot.slane %v3379_v25, %v3195_v2  ;;  %v4241_v34 = vrot.slane %v3382_v13, %v3195_v2  ;;  %v991_v60 = vrot.slane %v3386_v56, %v3195_v2 }
 0x10b   : > { %v2078_v24 = vadd.f32 %v2077_v17, %v2076_v30  ;;  %v1914_v23 = vadd.f32 %v1913_v1, %v1912_v59  ;;  %v1151_v52 = vrot.slane %v3379_v25, %v3206_v4  ;;  %v1266_v19 = vrot.slane %v3382_v13, %v3206_v4 }
 0x10c   : > { %v815_v55 = vrot.slane %v4240_v36, %v3069_v20  ;;  %v898_v61 = vrot.slane %v4241_v34, %v3069_v20 }
 0x10d   : > { %v2079_v27 = vrot.slane %v2078_v24, 1  ;;  %v1916_v28 = vadd.f32 %v1915_v39, %v1914_v23 }
 0x10e   : > { %v823_v35 = vmul.f32 %v815_v55, %v730_v40  ;;  %v828_v38 = vmul.f32 %v815_v55, %v735_v37  ;;  %v833_v21 = vmul.f32 %v815_v55, %v740_v10  ;;  %v838_v58 = vmul.f32 %v815_v55, %v745_v63 }
 0x10f   : > { %v843_v44 = vmul.f32 %v815_v55, %v750_v43  ;;  %v848_v47 = vmul.f32 %v815_v55, %v755_v14  ;;  %v853_v49 = vmul.f32 %v815_v55, %v760_v15  ;;  %v906_v9 = vmul.f32 %v898_v61, %v735_v37 }
 0x110   : > { %v911_v7 = vmul.f32 %v898_v61, %v740_v10  ;;  %v916_v50 = vmul.f32 %v898_v61, %v745_v63  ;;  %v2080_v30 = vadd.f32 %v2079_v27, %v2078_v24  ;;  %v1918_v8 = vadd.f32 %v1917_v48, %v1916_v28  ;;  %v770_v27 = vld [vmem:[%s3087_s21 + $0x158] sm:$0x7f] }
 0x111   : > { %v921_v32 = vmul.f32 %v898_v61, %v750_v43  ;;  %v926_v1 = vmul.f32 %v898_v61, %v755_v14  ;;  %v931_v17 = vmul.f32 %v898_v61, %v760_v15  ;;  %v936_v40 = vmul.f32 %v898_v61, %v765_v31 }
 0x112   : > { %v941_v59 = vadd.f32 %v906_v9, %v823_v35  ;;  %v946_v36 = vadd.f32 %v911_v7, %v828_v38  ;;  %v2139_v34 = vmul.f32 0.020408163, %v2080_v30  ;;  %v1920_v2 = vadd.f32 %v1919_v12, %v1918_v8  ;;  %v3631_v7 = vld [vmem:[%s3119_s23 + $0x90] sm:$0x7f] }
 0x113   : > { %v951_v39 = vadd.f32 %v916_v50, %v833_v21  ;;  %v956_v23 = vadd.f32 %v921_v32, %v838_v58  ;;  %v961_v11 = vadd.f32 %v926_v1, %v843_v44  ;;  %v966_v41 = vadd.f32 %v931_v17, %v848_v47  ;;  %v1094_v58 = vld [vmem:[%s3119_s23 + $0x18] sm:$0x7f] }
 0x114   : > { %v971_v55 = vadd.f32 %v936_v40, %v853_v49  ;;  %v1016_v37 = vrot.slane %v991_v60, %v3069_v20  ;;  %v2144_v48 = vadd.f32 0.001, %v2139_v34  ;;  %v1922_v24 = vadd.f32 %v1921_v54, %v1920_v2  ;;  %v1099_v49 = vld [vmem:[%s3119_s23 + $0x40] sm:$0x7f]  ;;  %v3628_v2 = vld [vmem:[%s3119_s23 + $0x68] sm:$0x7f] }
 0x115   : > { %v1176_v28 = vrot.slane %v1151_v52, %v3075_v22  ;;  %v1291_v61 = vrot.slane %v1266_v19, %v3075_v22 }
 0x116   : > { %v1024_v35 = vmul.f32 %v1016_v37, %v740_v10  ;;  %v1029_v12 = vmul.f32 %v1016_v37, %v745_v63  ;;  %v1034_v38 = vmul.f32 %v1016_v37, %v750_v43  ;;  %v1039_v21 = vmul.f32 %v1016_v37, %v755_v14  ;;  %v3634_v10 = vld [vmem:[%s3119_s23 + $0xb8] sm:$0x7f]  ;;  %v3637_v63 = vld [vmem:[%s3119_s23 + $0xe0] sm:$0x7f] }
 0x117   : > { %2630 = vrsqrt.f32 %v2144_v48  ;;  %v1923_v44 = vrot.slane %v1922_v24, 4  ;;  %v1044_v60 = vmul.f32 %v1016_v37, %v760_v15  ;;  %v1049_v47 = vmul.f32 %v1016_v37, %v765_v31  ;;  %v3640_v15 = vld [vmem:[%s3119_s23 + $0x108] sm:$0x7f] }
 0x118   : > { %v1054_v54 = vmul.f32 %v1016_v37, %v770_v27  ;;  %v1059_v52 = vadd.f32 %v1024_v35, %v941_v59  ;;  %v1064_v9 = vadd.f32 %v1029_v12, %v946_v36  ;;  %v1069_v19 = vadd.f32 %v1034_v38, %v951_v39  ;;  %v3648_v37 = vld [vmem:[%s3119_s23 + $0x130] sm:$0x7f] }
 0x119   : > { %v1924_v43 = vadd.f32 %v1923_v44, %v1922_v24  ;;  %v1074_v14 = vadd.f32 %v1039_v21, %v956_v23  ;;  %v1079_v50 = vadd.f32 %v1044_v60, %v961_v11  ;;  %v1084_v30 = vadd.f32 %v1049_v47, %v966_v41 }
 0x11a   : > { %v1089_v31 = vadd.f32 %v1054_v54, %v971_v55  ;;  %v1184_v8 = vmul.f32 %v1176_v28, %v1094_v58  ;;  %v1189_v32 = vmul.f32 %v1176_v28, %v1099_v49  ;;  %v1194_v1 = vmul.f32 %v1176_v28, %v3628_v2 }
 0x11b   : > { %v1925_v17 = vrot.slane %v1924_v43, 2  ;;  %v1199_v40 = vmul.f32 %v1176_v28, %v3631_v7  ;;  %v1204_v59 = vmul.f32 %v1176_v28, %v3634_v10  ;;  %v1209_v36 = vmul.f32 %v1176_v28, %v3637_v63 }
 0x11c   : > { %v1214_v34 = vmul.f32 %v1176_v28, %v3640_v15  ;;  %v1219_v39 = vadd.f32 %v1184_v8, %v1059_v52  ;;  %v1224_v11 = vadd.f32 %v1189_v32, %v1064_v9  ;;  %v1229_v23 = vadd.f32 %v1194_v1, %v1069_v19 }
 0x11d   : > { %v1926_v41 = vadd.f32 %v1925_v17, %v1924_v43  ;;  %v1234_v55 = vadd.f32 %v1199_v40, %v1074_v14  ;;  %v1239_v48 = vadd.f32 %v1204_v59, %v1079_v50  ;;  %v1244_v24 = vadd.f32 %v1209_v36, %v1084_v30  ;;  %v3659_v50 = vld [vmem:[%s3060_s26 + $0x10] sm:$0x7] }
 0x11e   : > { %v1249_v27 = vadd.f32 %v1214_v34, %v1089_v31  ;;  %v1299_v35 = vmul.f32 %v1291_v61, %v1099_v49  ;;  %v1304_v12 = vmul.f32 %v1291_v61, %v3628_v2  ;;  %v1309_v38 = vmul.f32 %v1291_v61, %v3631_v7 }
 0x11f   : > { %v1927_v21 = vrot.slane %v1926_v41, 1  ;;  %v1314_v58 = vmul.f32 %v1291_v61, %v3634_v10  ;;  %v1319_v28 = vmul.f32 %v1291_v61, %v3637_v63  ;;  %v1324_v44 = vmul.f32 %v1291_v61, %v3640_v15 }
 0x120   : > { %v1329_v60 = vmul.f32 %v1291_v61, %v3648_v37  ;;  %v1334_v47 = vadd.f32 %v1299_v35, %v1219_v39  ;;  %v1339_v54 = vadd.f32 %v1304_v12, %v1224_v11  ;;  %v1344_v52 = vadd.f32 %v1309_v38, %v1229_v23  ;;  %v1134_v38 = vld [vmem:[%s3119_s23 + $0x158] sm:$0x7f] }
 0x121   : > { %v3656_v9 = vpop.eup %2630  ;;  %v1928_v49 = vadd.f32 %v1927_v21, %v1926_v41  ;;  %v1349_v19 = vadd.f32 %v1314_v58, %v1234_v55  ;;  %v1354_v43 = vadd.f32 %v1319_v28, %v1239_v48  ;;  %v1359_v14 = vadd.f32 %v1324_v44, %v1244_v24 }
 0x122   : > { %v2156_v30 = vmul.f32 %v3656_v9, %v3503_v45  ;;  %v1364_v31 = vadd.f32 %v1329_v60, %v1249_v27  ;;  %v1381_v8 = vrot.slane %v3386_v56, %v3206_v4  ;;  %v1541_v61 = vrot.slane %v3379_v25, %v3209_v5 }
 0x123   : > { %v1970_v32 = vmul.f32 0.020408163, %v1928_v49  ;;  %v1656_v1 = vrot.slane %v3382_v13, %v3209_v5  ;;  %v4249_v13 = vrot.slane %v3659_v50, %v3069_v20 }
 0x124   : > { %v2217_v40 = vmul.f32 %v3547_v53, %v2156_v30  ;;  %v1406_v59 = vrot.slane %v1381_v8, %v3075_v22  ;;  %v1566_v45 = vrot.slane %v1541_v61, %v3084_v26  ;;  %v1484_v8 = vld [vmem:[%s3150_s8 + $0x18] sm:$0x7f]  ;;  %v1489_v61 = vld [vmem:[%s3150_s8 + $0x40] sm:$0x7f] }
 0x125   : > { %v3677_v36 = vsub.f32 %v3571_v46, %v1970_v32  ;;  %v3680_v25 = vsub.f32 %v3573_v18, %v1970_v32  ;;  %v3683_v34 = vsub.f32 %v3575_v33, %v1970_v32  ;;  %v3686_v39 = vsub.f32 %v3577_v29, %v1970_v32 }
 0x126   : > { %v2278_v11 = vadd.f32 %v3554_v51, %v2217_v40  ;;  %v3690_v23 = vsub.f32 %v3579_v57, %v1970_v32  ;;  %v3693_v41 = vsub.f32 %v3581_v6, %v1970_v32  ;;  %v3696_v46 = vsub.f32 %v3583_v42, %v1970_v32 }
 0x127   : > { %4242 = vst [vmem:[#allocation20_spill] sm:$0xff] %v3686_v39  ;;  %v2010_v18 = vmul.f32 %v3677_v36, %v3677_v36  ;;  %v2015_v33 = vmul.f32 %v3680_v25, %v3680_v25  ;;  %v2020_v29 = vmul.f32 %v3683_v34, %v3683_v34  ;;  %v2025_v57 = vmul.f32 %v3686_v39, %v3686_v39 }
 0x128   : > { %4243 = vst [vmem:[#allocation21_spill] sm:$0xff] %v3690_v23  ;;  %4244 = vst [vmem:[#allocation22_spill] sm:$0xff] %v3693_v41  ;;  %v2030_v6 = vmul.f32 %v3690_v23, %v3690_v23  ;;  %v2035_v42 = vmul.f32 %v3693_v41, %v3693_v41  ;;  %v2040_v55 = vmul.f32 %v3696_v46, %v3696_v46 }
 0x129   : > { %4245 = vst [vmem:[#allocation23_spill] sm:$0xff] %v3696_v46  ;;  %2313 = vst [vmem:[%s3514_s16 + $0x8] sm:$0x7f] %v2278_v11  ;;  %v1414_v48 = vmul.f32 %v1406_v59, %v3628_v2  ;;  %v2081_v24 = vsel %vm1871_vm0, %v2010_v18, 0.0  ;;  %v2082_v27 = vsel %vm1871_vm0, %v2015_v33, 0.0  ;;  %v2084_v35 = vsel %vm1871_vm0, %v2020_v29, 0.0 }
 0x12a   : > { %v2086_v12 = vsel %vm1871_vm0, %v2025_v57, 0.0  ;;  %v2083_v21 = vadd.f32 %v2082_v27, %v2081_v24  ;;  %v2088_v58 = vsel %vm1871_vm0, %v2030_v6, 0.0  ;;  %v2090_v28 = vsel %vm1871_vm0, %v2035_v42, 0.0  ;;  %v1494_v33 = vld [vmem:[%s3150_s8 + $0x68] sm:$0x7f] }
 0x12b   : > { %v2092_v44 = vsel %vm1871_vm0, %v2040_v55, 0.0  ;;  %v1419_v2 = vmul.f32 %v1406_v59, %v3631_v7  ;;  %v1424_v60 = vmul.f32 %v1406_v59, %v3634_v10  ;;  %v1429_v49 = vmul.f32 %v1406_v59, %v3637_v63  ;;  %v1499_v29 = vld [vmem:[%s3150_s8 + $0x90] sm:$0x7f]  ;;  %v1504_v57 = vld [vmem:[%s3150_s8 + $0xb8] sm:$0x7f] }
 0x12c   : > { %v1434_v30 = vmul.f32 %v1406_v59, %v3640_v15  ;;  %v2085_v32 = vadd.f32 %v2084_v35, %v2083_v21  ;;  %v1439_v40 = vmul.f32 %v1406_v59, %v3648_v37  ;;  %v1444_v11 = vmul.f32 %v1406_v59, %v1134_v38  ;;  %v1509_v55 = vld [vmem:[%s3150_s8 + $0xe0] sm:$0x7f]  ;;  %v1514_v24 = vld [vmem:[%s3150_s8 + $0x108] sm:$0x7f] }
 0x12d   : > { %v1449_v18 = vadd.f32 %v1414_v48, %v1334_v47  ;;  %v1454_v6 = vadd.f32 %v1419_v2, %v1339_v54  ;;  %v1459_v7 = vadd.f32 %v1424_v60, %v1344_v52  ;;  %v1464_v42 = vadd.f32 %v1429_v49, %v1349_v19  ;;  %v3740_v49 = vld [vmem:[%s3177_s11] sm:$0x1f] }
 0x12e   : > { %v1469_v10 = vadd.f32 %v1434_v30, %v1354_v43  ;;  %v2087_v63 = vadd.f32 %v2086_v12, %v2085_v32  ;;  %v1474_v27 = vadd.f32 %v1439_v40, %v1359_v14  ;;  %v1479_v15 = vadd.f32 %v1444_v11, %v1364_v31  ;;  %v1519_v12 = vld [vmem:[%s3150_s8 + $0x130] sm:$0x7f]  ;;  %4246 = vst [vmem:[#allocation24_spill] sm:$0xff] %v3740_v49 }
 0x12f   : > { %v1574_v4 = vmul.f32 %v1566_v45, %v1484_v8  ;;  %v1579_v17 = vmul.f32 %v1566_v45, %v1489_v61  ;;  %v1584_v35 = vmul.f32 %v1566_v45, %v1494_v33  ;;  %v1589_v37 = vmul.f32 %v1566_v45, %v1499_v29 }
 0x130   : > { %v1594_v59 = vmul.f32 %v1566_v45, %v1504_v57  ;;  %v2089_v47 = vadd.f32 %v2088_v58, %v2087_v63  ;;  %v1599_v48 = vmul.f32 %v1566_v45, %v1509_v55  ;;  %v1604_v38 = vmul.f32 %v1566_v45, %v1514_v24 }
 0x131   : > { %v1609_v54 = vadd.f32 %v1574_v4, %v1449_v18  ;;  %v1614_v52 = vadd.f32 %v1579_v17, %v1454_v6  ;;  %v1619_v19 = vadd.f32 %v1584_v35, %v1459_v7  ;;  %v1624_v43 = vadd.f32 %v1589_v37, %v1464_v42  ;;  %v3747_v17 = vld [vmem:[%s3182_s14] sm:$0x1f] }
 0x132   : > { %v1629_v21 = vadd.f32 %v1594_v59, %v1469_v10  ;;  %v2091_v2 = vadd.f32 %v2090_v28, %v2089_v47  ;;  %v1634_v14 = vadd.f32 %v1599_v48, %v1474_v27  ;;  %v1639_v60 = vadd.f32 %v1604_v38, %v1479_v15  ;;  %4247 = vst [vmem:[#allocation25_spill] sm:$0xff] %v3747_v17  ;;  %v1524_v10 = vld [vmem:[%s3150_s8 + $0x158] sm:$0x7f] }
 0x133   : > { %v1681_v31 = vrot.slane %v1656_v1, %v3084_v26  ;;  %v3744_v45 = vrot.slane %v3740_v49, %v3084_v26  ;;  %v3751_v4 = vrot.slane %v3747_v17, %v3084_v26  ;;  %v4248_v58 = vrot.slane %v3386_v56, %v3209_v5 }
 0x134   : > { %v819_v1 = vrot.slane %v4249_v13, %v3069_v20  ;;  %v2093_v30 = vadd.f32 %v2092_v44, %v2091_v2  ;;  %v3788_v13 = vld [vmem:[%s3060_s26 + $0x38] sm:$0x7] }
 0x135   : > { %v1796_v28 = vrot.slane %v4248_v58, %v3084_v26  ;;  %v1689_v8 = vmul.f32 %v1681_v31, %v1489_v61  ;;  %v1694_v32 = vmul.f32 %v1681_v31, %v1494_v33  ;;  %v1699_v40 = vmul.f32 %v1681_v31, %v1499_v29 }
 0x136   : > { %v1704_v11 = vmul.f32 %v1681_v31, %v1504_v57  ;;  %v1709_v18 = vmul.f32 %v1681_v31, %v1509_v55  ;;  %v1714_v6 = vmul.f32 %v1681_v31, %v1514_v24  ;;  %v1719_v7 = vmul.f32 %v1681_v31, %v1519_v12 }
 0x137   : > { %v2094_v42 = vrot.slane %v2093_v30, 4  ;;  %v1724_v63 = vadd.f32 %v1689_v8, %v1609_v54  ;;  %v1729_v27 = vadd.f32 %v1694_v32, %v1614_v52  ;;  %v1734_v15 = vadd.f32 %v1699_v40, %v1619_v19 }
 0x138   : > { %v1739_v5 = vadd.f32 %v1704_v11, %v1624_v43  ;;  %v1744_v56 = vadd.f32 %v1709_v18, %v1629_v21  ;;  %v1749_v35 = vadd.f32 %v1714_v6, %v1634_v14  ;;  %v1754_v37 = vadd.f32 %v1719_v7, %v1639_v60  ;;  %v736_v21 = vld [vmem:[%s3087_s21 + $0x48] sm:$0x7f]  ;;  %v741_v11 = vld [vmem:[%s3087_s21 + $0x70] sm:$0x7f]  ;;  %v746_v7 = vld [vmem:[%s3087_s21 + $0x98] sm:$0x7f] }
 0x139   : > { %v2095_v59 = vadd.f32 %v2094_v42, %v2093_v30  ;;  %v1804_v47 = vmul.f32 %v1796_v28, %v1494_v33  ;;  %v1809_v44 = vmul.f32 %v1796_v28, %v1499_v29  ;;  %v1814_v61 = vmul.f32 %v1796_v28, %v1504_v57  ;;  %v751_v42 = vld [vmem:[%s3087_s21 + $0xc0] sm:$0x7f] }
 0x13a   : > { %v1819_v48 = vmul.f32 %v1796_v28, %v1509_v55  ;;  %v1824_v38 = vmul.f32 %v1796_v28, %v1514_v24  ;;  %v1829_v2 = vmul.f32 %v1796_v28, %v1519_v12  ;;  %v1834_v31 = vmul.f32 %v1796_v28, %v1524_v10  ;;  %v3777_v55 = vld [vmem:[%s3060_s26 + $0x24] sm:$0x7]  ;;  %v731_v24 = vld [vmem:[%s3087_s21 + $0x20] sm:$0x7f] }
 0x13b   : > { %v2096_v58 = vrot.slane %v2095_v59, 2  ;;  %v3762_v54 = vadd.f32 %v1804_v47, %v1724_v63  ;;  %v3764_v52 = vadd.f32 %v1809_v44, %v1729_v27  ;;  %v3766_v19 = vadd.f32 %v1814_v61, %v1734_v15  ;;  %v756_v15 = vld [vmem:[%s3087_s21 + $0xe8] sm:$0x7f] }
 0x13c   : > { %v3768_v43 = vadd.f32 %v1819_v48, %v1739_v5  ;;  %v3770_v33 = vadd.f32 %v1824_v38, %v1744_v56  ;;  %v3772_v29 = vadd.f32 %v1829_v2, %v1749_v35  ;;  %v3774_v57 = vadd.f32 %v1834_v31, %v1754_v37  ;;  %v761_v5 = vld [vmem:[%s3087_s21 + $0x110] sm:$0x7f] }
 0x13d   : > { %v2097_v12 = vadd.f32 %v2096_v58, %v2095_v59  ;;  %v1929_v14 = vsel %vm1871_vm0, %v3762_v54, 0.0  ;;  %v1930_v60 = vsel %vm1871_vm0, %v3764_v52, 0.0  ;;  %v1932_v28 = vsel %vm1871_vm0, %v3766_v19, 0.0 }
 0x13e   : > { %v1931_v30 = vadd.f32 %v1930_v60, %v1929_v14  ;;  %v1934_v8 = vsel %vm1871_vm0, %v3768_v43, 0.0  ;;  %v1936_v32 = vsel %vm1871_vm0, %v3770_v33, 0.0  ;;  %v1938_v40 = vsel %vm1871_vm0, %v3772_v29, 0.0  ;;  %v766_v60 = vld [vmem:[%s3087_s21 + $0x138] sm:$0x7f] }
 0x13f   : > { %v2098_v18 = vrot.slane %v2097_v12, 1  ;;  %v1940_v6 = vsel %vm1871_vm0, %v3774_v57, 0.0  ;;  %v824_v10 = vmul.f32 %v819_v1, %v731_v24  ;;  %v829_v63 = vmul.f32 %v819_v1, %v736_v21 }
 0x140   : > { %v1933_v27 = vadd.f32 %v1932_v28, %v1931_v30  ;;  %v834_v56 = vmul.f32 %v819_v1, %v741_v11  ;;  %v839_v35 = vmul.f32 %v819_v1, %v746_v7  ;;  %v844_v37 = vmul.f32 %v819_v1, %v751_v42 }
 0x141   : > { %v2099_v59 = vadd.f32 %v2098_v18, %v2097_v12  ;;  %v849_v47 = vmul.f32 %v819_v1, %v756_v15  ;;  %v854_v44 = vmul.f32 %v819_v1, %v761_v5  ;;  %v877_v61 = vrot.slane %v3777_v55, %v3069_v20 }
 0x142   : > { %v1935_v48 = vadd.f32 %v1934_v8, %v1933_v27  ;;  %v995_v38 = vrot.slane %v3788_v13, %v3069_v20  ;;  %v1155_v2 = vrot.slane %v3659_v50, %v3075_v22  ;;  %v1270_v31 = vrot.slane %v3777_v55, %v3075_v22 }
 0x143   : > { %v2140_v58 = vmul.f32 0.020408163, %v2099_v59  ;;  %v902_v24 = vrot.slane %v877_v61, %v3069_v20 }
 0x144   : > { %v1937_v14 = vadd.f32 %v1936_v32, %v1935_v48  ;;  %v1020_v28 = vrot.slane %v995_v38, %v3069_v20  ;;  %v1180_v30 = vrot.slane %v1155_v2, %v3075_v22  ;;  %v3820_v8 = vrot.slane %v1270_v31, %v3075_v22  ;;  %v771_v38 = vld [vmem:[%s3087_s21 + $0x160] sm:$0x7f] }
 0x145   : > { %v2145_v18 = vadd.f32 0.001, %v2140_v58  ;;  %v907_v27 = vmul.f32 %v902_v24, %v736_v21  ;;  %v912_v59 = vmul.f32 %v902_v24, %v741_v11  ;;  %v917_v61 = vmul.f32 %v902_v24, %v746_v7 }
 0x146   : > { %v1939_v17 = vadd.f32 %v1938_v40, %v1937_v14  ;;  %v922_v49 = vmul.f32 %v902_v24, %v751_v42  ;;  %v927_v12 = vmul.f32 %v902_v24, %v756_v15  ;;  %v932_v46 = vmul.f32 %v902_v24, %v761_v5 }
 0x147   : > { %2632 = vrsqrt.f32 %v2145_v18  ;;  %v937_v1 = vmul.f32 %v902_v24, %v766_v60  ;;  %v942_v32 = vadd.f32 %v907_v27, %v824_v10  ;;  %v947_v20 = vadd.f32 %v912_v59, %v829_v63  ;;  %v1095_v18 = vld [vmem:[%s3119_s23 + $0x20] sm:$0x7f]  ;;  %v1100_v63 = vld [vmem:[%s3119_s23 + $0x48] sm:$0x7f] }
 0x148   : > { %v1941_v48 = vadd.f32 %v1940_v6, %v1939_v17  ;;  %v952_v2 = vadd.f32 %v917_v61, %v834_v56  ;;  %v957_v41 = vadd.f32 %v922_v49, %v839_v35  ;;  %v962_v31 = vadd.f32 %v927_v12, %v844_v37  ;;  %v1105_v35 = vld [vmem:[%s3119_s23 + $0x70] sm:$0x7f]  ;;  %v3827_v37 = vld [vmem:[%s3119_s23 + $0x98] sm:$0x7f] }
 0x149   : > { %v967_v21 = vadd.f32 %v932_v46, %v849_v47  ;;  %v972_v58 = vadd.f32 %v937_v1, %v854_v44  ;;  %v1025_v40 = vmul.f32 %v1020_v28, %v741_v11  ;;  %v1030_v14 = vmul.f32 %v1020_v28, %v746_v7  ;;  %v3830_v46 = vld [vmem:[%s3119_s23 + $0xc0] sm:$0x7f] }
 0x14a   : > { %v1942_v23 = vrot.slane %v1941_v48, 4  ;;  %v1035_v39 = vmul.f32 %v1020_v28, %v751_v42  ;;  %v1040_v24 = vmul.f32 %v1020_v28, %v756_v15  ;;  %v1045_v10 = vmul.f32 %v1020_v28, %v761_v5  ;;  %v3833_v42 = vld [vmem:[%s3119_s23 + $0xe8] sm:$0x7f]  ;;  %v3836_v15 = vld [vmem:[%s3119_s23 + $0x110] sm:$0x7f] }
 0x14b   : > { %v1050_v17 = vmul.f32 %v1020_v28, %v766_v60  ;;  %v1055_v6 = vmul.f32 %v1020_v28, %v771_v38  ;;  %v1060_v56 = vadd.f32 %v1025_v40, %v942_v32  ;;  %v1065_v49 = vadd.f32 %v1030_v14, %v947_v20 }
 0x14c   : > { %v1943_v47 = vadd.f32 %v1942_v23, %v1941_v48  ;;  %v1070_v11 = vadd.f32 %v1035_v39, %v952_v2  ;;  %v1075_v7 = vadd.f32 %v1040_v24, %v957_v41  ;;  %v1080_v44 = vadd.f32 %v1045_v10, %v962_v31  ;;  %v1130_v48 = vld [vmem:[%s3119_s23 + $0x138] sm:$0x7f] }
 0x14d   : > { %v1085_v5 = vadd.f32 %v1050_v17, %v967_v21  ;;  %v1090_v12 = vadd.f32 %v1055_v6, %v972_v58  ;;  %v1185_v1 = vmul.f32 %v1180_v30, %v1095_v18  ;;  %v1190_v60 = vmul.f32 %v1180_v30, %v1100_v63 }
 0x14e   : > { %v1944_v28 = vrot.slane %v1943_v47, 2  ;;  %v1195_v27 = vmul.f32 %v1180_v30, %v1105_v35  ;;  %v1200_v59 = vmul.f32 %v1180_v30, %v3827_v37  ;;  %v1205_v61 = vmul.f32 %v1180_v30, %v3830_v46 }
 0x14f   : > { %v1210_v23 = vmul.f32 %v1180_v30, %v3833_v42  ;;  %v1215_v39 = vmul.f32 %v1180_v30, %v3836_v15  ;;  %v1220_v41 = vadd.f32 %v1185_v1, %v1060_v56  ;;  %v1225_v32 = vadd.f32 %v1190_v60, %v1065_v49 }
 0x150   : > { %v1945_v20 = vadd.f32 %v1944_v28, %v1943_v47  ;;  %v1230_v38 = vadd.f32 %v1195_v27, %v1070_v11  ;;  %v1235_v2 = vadd.f32 %v1200_v59, %v1075_v7  ;;  %v1240_v31 = vadd.f32 %v1205_v61, %v1080_v44 }
 0x151   : > { %v3843_v21 = vpop.eup %2632  ;;  %v1245_v58 = vadd.f32 %v1210_v23, %v1085_v5  ;;  %v1250_v40 = vadd.f32 %v1215_v39, %v1090_v12  ;;  %v1300_v14 = vmul.f32 %v3820_v8, %v1100_v63  ;;  %v1305_v24 = vmul.f32 %v3820_v8, %v1105_v35 }
 0x152   : > { %v2157_v10 = vmul.f32 %v3843_v21, %v3677_v36  ;;  %v1946_v18 = vrot.slane %v1945_v20, 1  ;;  %v1310_v30 = vmul.f32 %v3820_v8, %v3827_v37  ;;  %v1315_v17 = vmul.f32 %v3820_v8, %v3830_v46 }
 0x153   : > { %v1320_v6 = vmul.f32 %v3820_v8, %v3833_v42  ;;  %v1325_v56 = vmul.f32 %v3820_v8, %v3836_v15  ;;  %v1330_v63 = vmul.f32 %v3820_v8, %v1130_v48  ;;  %v1335_v49 = vadd.f32 %v1300_v14, %v1220_v41  ;;  %v4251_v8 = vld [vmem:[#allocation7_spill] sm:$0xff] }
 0x154   : > { %v2218_v47 = vmul.f32 %v3744_v45, %v2157_v10  ;;  %v1947_v36 = vadd.f32 %v1946_v18, %v1945_v20  ;;  %v1340_v11 = vadd.f32 %v1305_v24, %v1225_v32  ;;  %v1345_v7 = vadd.f32 %v1310_v30, %v1230_v38  ;;  %v1135_v30 = vld [vmem:[%s3119_s23 + $0x160] sm:$0x7f] }
 0x155   : > { %v1350_v44 = vadd.f32 %v1315_v17, %v1235_v2  ;;  %v1355_v5 = vadd.f32 %v1320_v6, %v1240_v31  ;;  %v1360_v12 = vadd.f32 %v1325_v56, %v1245_v58  ;;  %v1365_v1 = vadd.f32 %v1330_v63, %v1250_v40  ;;  %v1515_v32 = vld [vmem:[%s3150_s8 + $0x110] sm:$0x7f] }
 0x156   : > { %v2279_v60 = vadd.f32 %v3751_v4, %v2218_v47  ;;  %v1971_v28 = vmul.f32 0.020408163, %v1947_v36  ;;  %v4250_v27 = vrot.slane %v3788_v13, %v3075_v22  ;;  %v4252_v23 = vrot.slane %v3659_v50, %v3084_v26 }
 0x158   : > { %v1410_v59 = vrot.slane %v4250_v27, %v3075_v22  ;;  %v1570_v39 = vrot.slane %v4252_v23, %v3084_v26  ;;  %2314 = vst [vmem:[%s3514_s16 + $0x10] sm:$0x7f] %v2279_v60  ;;  %v3875_v20 = vsub.f32 %v3762_v54, %v1971_v28  ;;  %v3878_v38 = vsub.f32 %v3764_v52, %v1971_v28  ;;  %v1490_v27 = vld [vmem:[%s3150_s8 + $0x48] sm:$0x7f]  ;;  %v1495_v23 = vld [vmem:[%s3150_s8 + $0x70] sm:$0x7f] }
 0x159   : > { %v3881_v22 = vsub.f32 %v3766_v19, %v1971_v28  ;;  %v3884_v2 = vsub.f32 %v3768_v43, %v1971_v28  ;;  %v3887_v50 = vsub.f32 %v3770_v33, %v1971_v28  ;;  %v3890_v31 = vsub.f32 %v3772_v29, %v1971_v28 }
 0x15a   : > { %v3893_v58 = vsub.f32 %v3774_v57, %v1971_v28  ;;  %v1415_v54 = vmul.f32 %v1410_v59, %v1105_v35  ;;  %v2011_v52 = vmul.f32 %v3875_v20, %v3875_v20  ;;  %v2016_v19 = vmul.f32 %v3878_v38, %v3878_v38  ;;  %v1485_v28 = vld [vmem:[%s3150_s8 + $0x20] sm:$0x7f] }
 0x15b   : > { %4253 = vst [vmem:[#allocation7_spill] sm:$0xff] %v3887_v50  ;;  %4254 = vst [vmem:[#allocation26_spill] sm:$0xff] %v3890_v31  ;;  %v2021_v43 = vmul.f32 %v3881_v22, %v3881_v22  ;;  %v2026_v33 = vmul.f32 %v3884_v2, %v3884_v2  ;;  %v2031_v29 = vmul.f32 %v3887_v50, %v3887_v50 }
 0x15c   : > { %4255 = vst [vmem:[#allocation27_spill] sm:$0xff] %v3893_v58  ;;  %v2036_v57 = vmul.f32 %v3890_v31, %v3890_v31  ;;  %v2041_v35 = vmul.f32 %v3893_v58, %v3893_v58  ;;  %v1420_v40 = vmul.f32 %v1410_v59, %v3827_v37  ;;  %v2100_v14 = vsel %vm1871_vm0, %v2011_v52, 0.0 }
 0x15d   : > { %v2101_v24 = vsel %vm1871_vm0, %v2016_v19, 0.0  ;;  %v2103_v10 = vsel %vm1871_vm0, %v2021_v43, 0.0  ;;  %v2105_v18 = vsel %vm1871_vm0, %v2026_v33, 0.0  ;;  %v2107_v6 = vsel %vm1871_vm0, %v2031_v29, 0.0  ;;  %v1500_v29 = vld [vmem:[%s3150_s8 + $0x98] sm:$0x7f] }
 0x15e   : > { %v2102_v17 = vadd.f32 %v2101_v24, %v2100_v14  ;;  %v2109_v56 = vsel %vm1871_vm0, %v2036_v57, 0.0  ;;  %v2111_v37 = vsel %vm1871_vm0, %v2041_v35, 0.0  ;;  %v1425_v63 = vmul.f32 %v1410_v59, %v3830_v46  ;;  %v1505_v14 = vld [vmem:[%s3150_s8 + $0xc0] sm:$0x7f]  ;;  %v1510_v57 = vld [vmem:[%s3150_s8 + $0xe8] sm:$0x7f] }
 0x15f   : > { %v1430_v47 = vmul.f32 %v1410_v59, %v3833_v42  ;;  %v1435_v36 = vmul.f32 %v1410_v59, %v3836_v15  ;;  %v1440_v60 = vmul.f32 %v1410_v59, %v1130_v48  ;;  %v1445_v19 = vmul.f32 %v1410_v59, %v1135_v30 }
 0x160   : > { %v2104_v52 = vadd.f32 %v2103_v10, %v2102_v17  ;;  %v1450_v43 = vadd.f32 %v1415_v54, %v1335_v49  ;;  %v1455_v33 = vadd.f32 %v1420_v40, %v1340_v11  ;;  %v1460_v24 = vadd.f32 %v1425_v63, %v1345_v7  ;;  %v4258_v63 = vld [vmem:[#allocation10_spill] sm:$0xff] }
 0x161   : > { %v1465_v35 = vadd.f32 %v1430_v47, %v1350_v44  ;;  %v1470_v61 = vadd.f32 %v1435_v36, %v1355_v5  ;;  %v1475_v46 = vadd.f32 %v1440_v60, %v1360_v12  ;;  %v1480_v41 = vadd.f32 %v1445_v19, %v1365_v1  ;;  %v1520_v12 = vld [vmem:[%s3150_s8 + $0x138] sm:$0x7f]  ;;  %v1525_v19 = vld [vmem:[%s3150_s8 + $0x160] sm:$0x7f] }
 0x162   : > { %v2106_v42 = vadd.f32 %v2105_v18, %v2104_v52  ;;  %v1575_v15 = vmul.f32 %v1570_v39, %v1485_v28  ;;  %v1580_v48 = vmul.f32 %v1570_v39, %v1490_v27  ;;  %v1585_v58 = vmul.f32 %v1570_v39, %v1495_v23 }
 0x163   : > { %v1590_v31 = vmul.f32 %v1570_v39, %v1500_v29  ;;  %v1595_v50 = vmul.f32 %v1570_v39, %v1505_v14  ;;  %v1600_v10 = vmul.f32 %v1570_v39, %v1510_v57  ;;  %v1605_v49 = vmul.f32 %v1570_v39, %v1515_v32 }
 0x164   : > { %v2108_v59 = vadd.f32 %v2107_v6, %v2106_v42  ;;  %v1610_v11 = vadd.f32 %v1575_v15, %v1450_v43  ;;  %v1615_v54 = vadd.f32 %v1580_v48, %v1455_v33  ;;  %v1620_v40 = vadd.f32 %v1585_v58, %v1460_v24 }
 0x165   : > { %v1625_v30 = vadd.f32 %v1590_v31, %v1465_v35  ;;  %v1630_v7 = vadd.f32 %v1595_v50, %v1470_v61  ;;  %v1635_v44 = vadd.f32 %v1600_v10, %v1475_v46  ;;  %v1640_v17 = vadd.f32 %v1605_v49, %v1480_v41  ;;  %v4259_v50 = vld [vmem:[#allocation11_spill] sm:$0xff] }
 0x166   : > { %v2110_v5 = vadd.f32 %v2109_v56, %v2108_v59  ;;  %v4256_v1 = vrot.slane %v3777_v55, %v3084_v26  ;;  %v4257_v6 = vrot.slane %v3788_v13, %v3084_v26  ;;  %v2160_v58 = vmul.f32 %v3484_v62, %v4258_v63 }
 0x167   : > { %v2161_v61 = vmul.f32 %v3656_v9, %v3506_v0  ;;  %v2162_v41 = vmul.f32 %v3843_v21, %v3680_v25  ;;  %v2165_v31 = vmul.f32 %v3484_v62, %v4259_v50 }
 0x168   : > { %v1685_v18 = vrot.slane %v4256_v1, %v3084_v26  ;;  %v1800_v39 = vrot.slane %v4257_v6, %v3084_v26  ;;  %v2112_v55 = vadd.f32 %v2111_v37, %v2110_v5  ;;  %v2221_v63 = vmul.f32 %v3199_v3, %v2160_v58 }
 0x169   : > { %v2222_v50 = vmul.f32 %v3547_v53, %v2161_v61  ;;  %v2167_v58 = vmul.f32 %v3843_v21, %v3683_v34 }
 0x16a   : > { %v1690_v56 = vmul.f32 %v1685_v18, %v1490_v27  ;;  %v1695_v47 = vmul.f32 %v1685_v18, %v1495_v23  ;;  %v1700_v36 = vmul.f32 %v1685_v18, %v1500_v29  ;;  %v1705_v60 = vmul.f32 %v1685_v18, %v1505_v14 }
 0x16b   : > { %v1710_v28 = vmul.f32 %v1685_v18, %v1510_v57  ;;  %v1715_v13 = vmul.f32 %v1685_v18, %v1515_v32  ;;  %v1720_v26 = vmul.f32 %v1685_v18, %v1520_v12  ;;  %v2113_v52 = vrot.slane %v2112_v55, 4 }
 0x16c   : > { %v1725_v43 = vadd.f32 %v1690_v56, %v1610_v11  ;;  %v1730_v33 = vadd.f32 %v1695_v47, %v1615_v54  ;;  %v1735_v24 = vadd.f32 %v1700_v36, %v1620_v40  ;;  %v1740_v0 = vadd.f32 %v1705_v60, %v1625_v30 }
 0x16d   : > { %v1745_v35 = vadd.f32 %v1710_v28, %v1630_v7  ;;  %v1750_v46 = vadd.f32 %v1715_v13, %v1635_v44  ;;  %v1755_v25 = vadd.f32 %v1720_v26, %v1640_v17  ;;  %v2114_v42 = vadd.f32 %v2113_v52, %v2112_v55  ;;  %v4260_v28 = vld [vmem:[#allocation9_spill] sm:$0xff] }
 0x16e   : > { %v1805_v15 = vmul.f32 %v1800_v39, %v1495_v23  ;;  %v1810_v48 = vmul.f32 %v1800_v39, %v1500_v29  ;;  %v1815_v37 = vmul.f32 %v1800_v39, %v1505_v14  ;;  %v1820_v27 = vmul.f32 %v1800_v39, %v1510_v57 }
 0x16f   : > { %v1825_v10 = vmul.f32 %v1800_v39, %v1515_v32  ;;  %v1830_v59 = vmul.f32 %v1800_v39, %v1520_v12  ;;  %v1835_v49 = vmul.f32 %v1800_v39, %v1525_v19  ;;  %v2115_v5 = vrot.slane %v2114_v42, 2 }
 0x170   : > { %v3946_v1 = vadd.f32 %v1805_v15, %v1725_v43  ;;  %v3948_v18 = vadd.f32 %v1810_v48, %v1730_v33  ;;  %v3950_v11 = vadd.f32 %v1815_v37, %v1735_v24  ;;  %v3952_v54 = vadd.f32 %v1820_v27, %v1740_v0  ;;  %v4261_v43 = vld [vmem:[#allocation12_spill] sm:$0xff] }
 0x171   : > { %v3954_v40 = vadd.f32 %v1825_v10, %v1745_v35  ;;  %v3956_v30 = vadd.f32 %v1830_v59, %v1750_v46  ;;  %v3958_v23 = vadd.f32 %v1835_v49, %v1755_v25  ;;  %v2116_v29 = vadd.f32 %v2115_v5, %v2114_v42  ;;  %v4262_v24 = vld [vmem:[#allocation16_spill] sm:$0xff]  ;;  %v4264_v42 = vld [vmem:[#allocation13_spill] sm:$0xff] }
 0x172   : > { %v1948_v32 = vsel %vm1871_vm0, %v3946_v1, 0.0  ;;  %v1949_v14 = vsel %vm1871_vm0, %v3948_v18, 0.0  ;;  %v1951_v57 = vsel %vm1871_vm0, %v3950_v11, 0.0  ;;  %v1953_v44 = vsel %vm1871_vm0, %v3952_v54, 0.0  ;;  %v4263_v46 = vld [vmem:[#allocation20_spill] sm:$0xff] }
 0x173   : > { %v1950_v7 = vadd.f32 %v1949_v14, %v1948_v32  ;;  %v1955_v12 = vsel %vm1871_vm0, %v3954_v40, 0.0  ;;  %v1957_v17 = vsel %vm1871_vm0, %v3956_v30, 0.0  ;;  %v2117_v6 = vrot.slane %v2116_v29, 1 }
 0x174   : > { %v1959_v39 = vsel %vm1871_vm0, %v3958_v23, 0.0  ;;  %v2223_v56 = vmul.f32 %v3744_v45, %v2162_v41  ;;  %v2226_v47 = vmul.f32 %v3199_v3, %v2165_v31  ;;  %v2166_v36 = vmul.f32 %v3656_v9, %v3509_v16 }
 0x175   : > { %v1952_v55 = vadd.f32 %v1951_v57, %v1950_v7  ;;  %v2118_v60 = vadd.f32 %v2117_v6, %v2116_v29  ;;  %v2282_v13 = vadd.f32 %v4260_v28, %v2221_v63  ;;  %v2283_v26 = vadd.f32 %v3554_v51, %v2222_v50  ;;  %v4265_v29 = vld [vmem:[#allocation17_spill] sm:$0xff] }
 0x176   : > { %v2284_v61 = vadd.f32 %v3751_v4, %v2223_v56  ;;  %v2287_v41 = vadd.f32 %v4260_v28, %v2226_v47  ;;  %v2227_v31 = vmul.f32 %v3547_v53, %v2166_v36  ;;  %v2228_v16 = vmul.f32 %v3744_v45, %v2167_v58  ;;  %v4266_v7 = vld [vmem:[#allocation21_spill] sm:$0xff]  ;;  %v4268_v47 = vld [vmem:[#allocation18_spill] sm:$0xff]  ;;  %v4270_v58 = vld [vmem:[#allocation15_spill] sm:$0xff] }
 0x177   : > { %v1954_v52 = vadd.f32 %v1953_v44, %v1952_v55  ;;  %v2141_v19 = vmul.f32 0.020408163, %v2118_v60  ;;  %2317 = vst [vmem:[%s3514_s16 + $0x28] sm:$0x7f] %v2282_v13  ;;  %2318 = vst [vmem:[%s3514_s16 + $0x30] sm:$0x7f] %v2283_v26  ;;  %v2170_v33 = vmul.f32 %v3484_v62, %v4261_v43  ;;  %v2171_v0 = vmul.f32 %v3656_v9, %v4262_v24 }
 0x178   : > { %2319 = vst [vmem:[%s3514_s16 + $0x38] sm:$0x7f] %v2284_v61  ;;  %2322 = vst [vmem:[%s3514_s16 + $0x50] sm:$0x7f] %v2287_v41  ;;  %v2288_v35 = vadd.f32 %v3554_v51, %v2227_v31  ;;  %v2172_v25 = vmul.f32 %v3843_v21, %v4263_v46  ;;  %v2175_v15 = vmul.f32 %v3484_v62, %v4264_v42  ;;  %v4267_v55 = vld [vmem:[#allocation14_spill] sm:$0xff]  ;;  %v4271_v61 = vld [vmem:[#allocation19_spill] sm:$0xff] }
 0x179   : > { %v1956_v34 = vadd.f32 %v1955_v12, %v1954_v52  ;;  %v2146_v48 = vadd.f32 0.001, %v2141_v19  ;;  %v2289_v37 = vadd.f32 %v3751_v4, %v2228_v16  ;;  %v2231_v27 = vmul.f32 %v3199_v3, %v2170_v33  ;;  %v4269_v60 = vld [vmem:[#allocation22_spill] sm:$0xff] }
 0x17a   : > { %v2232_v10 = vmul.f32 %v3547_v53, %v2171_v0  ;;  %2323 = vst [vmem:[%s3514_s16 + $0x58] sm:$0x7f] %v2288_v35  ;;  %v2233_v49 = vmul.f32 %v3744_v45, %v2172_v25  ;;  %v2236_v5 = vmul.f32 %v3199_v3, %v2175_v15  ;;  %v2176_v32 = vmul.f32 %v3656_v9, %v4265_v29  ;;  %v4272_v0 = vld [vmem:[#allocation23_spill] sm:$0xff] }
 0x17b   : > { %v1958_v59 = vadd.f32 %v1957_v17, %v1956_v34  ;;  %2634 = vrsqrt.f32 %v2146_v48  ;;  %2324 = vst [vmem:[%s3514_s16 + $0x60] sm:$0x7f] %v2289_v37  ;;  %v2292_v14 = vadd.f32 %v4260_v28, %v2231_v27  ;;  %v2177_v44 = vmul.f32 %v3843_v21, %v4266_v7  ;;  %v4278_v7 = vld [vmem:[#allocation26_spill] sm:$0xff] }
 0x17c   : > { %v2293_v57 = vadd.f32 %v3554_v51, %v2232_v10  ;;  %v2294_v17 = vadd.f32 %v3751_v4, %v2233_v49  ;;  %v2297_v6 = vadd.f32 %v4260_v28, %v2236_v5  ;;  %v2237_v63 = vmul.f32 %v3547_v53, %v2176_v32 }
 0x17d   : > { %v1960_v12 = vadd.f32 %v1959_v39, %v1958_v59  ;;  %2327 = vst [vmem:[%s3514_s16 + $0x78] sm:$0x7f] %v2292_v14  ;;  %v2238_v50 = vmul.f32 %v3744_v45, %v2177_v44  ;;  %v2180_v56 = vmul.f32 %v3484_v62, %v4267_v55  ;;  %v2181_v36 = vmul.f32 %v3656_v9, %v4268_v47  ;;  %v4276_v59 = vld [vmem:[#allocation25_spill] sm:$0xff]  ;;  %v4277_v14 = vld [vmem:[#allocation7_spill] sm:$0xff] }
 0x17e   : > { %2328 = vst [vmem:[%s3514_s16 + $0x80] sm:$0x7f] %v2293_v57  ;;  %v2182_v39 = vmul.f32 %v3843_v21, %v4269_v60  ;;  %2329 = vst [vmem:[%s3514_s16 + $0x88] sm:$0x7f] %v2294_v17  ;;  %v2298_v26 = vadd.f32 %v3554_v51, %v2237_v63  ;;  %v2185_v52 = vmul.f32 %v3484_v62, %v4270_v58 }
 0x17f   : > { %v1961_v13 = vrot.slane %v1960_v12, 4  ;;  %2332 = vst [vmem:[%s3514_s16 + $0xa0] sm:$0x7f] %v2297_v6  ;;  %v2186_v41 = vmul.f32 %v3656_v9, %v4271_v61  ;;  %v2299_v31 = vadd.f32 %v3751_v4, %v2238_v50  ;;  %v2241_v19 = vmul.f32 %v3199_v3, %v2180_v56 }
 0x180   : > { %v2242_v16 = vmul.f32 %v3547_v53, %v2181_v36  ;;  %v2243_v43 = vmul.f32 %v3744_v45, %v2182_v39  ;;  %2333 = vst [vmem:[%s3514_s16 + $0xa8] sm:$0x7f] %v2298_v26  ;;  %v2246_v24 = vmul.f32 %v3199_v3, %v2185_v52  ;;  %v2187_v9 = vmul.f32 %v3843_v21, %v4272_v0  ;;  %v4274_v21 = vld [vmem:[#allocation24_spill] sm:$0xff] }
 0x181   : > { %v1962_v33 = vadd.f32 %v1961_v13, %v1960_v12  ;;  %v2247_v62 = vmul.f32 %v3547_v53, %v2186_v41  ;;  %2334 = vst [vmem:[%s3514_s16 + $0xb0] sm:$0x7f] %v2299_v31  ;;  %v2302_v34 = vadd.f32 %v4260_v28, %v2241_v19  ;;  %v4273_v53 = vsub.s32 3, %v4251_v8 }
 0x182   : > { %v2303_v35 = vadd.f32 %v3554_v51, %v2242_v16  ;;  %v2304_v46 = vadd.f32 %v3751_v4, %v2243_v43  ;;  %v2307_v42 = vadd.f32 %v4260_v28, %v2246_v24  ;;  %v2248_v3 = vmul.f32 %v3744_v45, %v2187_v9 }
 0x183   : > { %v1963_v25 = vrot.slane %v1962_v33, 2  ;;  %v2308_v15 = vadd.f32 %v3554_v51, %v2247_v62  ;;  %2337 = vst [vmem:[%s3514_s16 + $0xc8] sm:$0x7f] %v2302_v34  ;;  %v2206_v48 = vrot.slane %v4274_v21, %v4273_v53  ;;  %v4275_v28 = vmov %v4273_v53 }
 0x184   : > { %2338 = vst [vmem:[%s3514_s16 + $0xd0] sm:$0x7f] %v2303_v35  ;;  %2339 = vst [vmem:[%s3514_s16 + $0xd8] sm:$0x7f] %v2304_v46  ;;  %v2309_v27 = vadd.f32 %v3751_v4, %v2248_v3  ;;  %v2267_v51 = vrot.slane %v4276_v59, %v4275_v28  ;;  %v4279_v4 = vld [vmem:[#allocation27_spill] sm:$0xff] }
 0x185   : > { %v1964_v37 = vadd.f32 %v1963_v25, %v1962_v33  ;;  %2342 = vst [vmem:[%s3514_s16 + $0xf0] sm:$0x7f] %v2307_v42  ;;  %2343 = vst [vmem:[%s3514_s16 + $0xf8] sm:$0x7f] %v2308_v15  ;;  %v2635_v10 = vpop.eup %2634 }
 0x186   : > { %v2158_v49 = vmul.f32 %v2635_v10, %v3875_v20  ;;  %v2163_v5 = vmul.f32 %v2635_v10, %v3878_v38  ;;  %v2168_v29 = vmul.f32 %v2635_v10, %v3881_v22  ;;  %2344 = vst [vmem:[%s3514_s16 + $0x100] sm:$0x7f] %v2309_v27  ;;  %v2173_v32 = vmul.f32 %v2635_v10, %v3884_v2 }
 0x187   : > { %v1965_v45 = vrot.slane %v1964_v37, 1  ;;  %v2178_v57 = vmul.f32 %v2635_v10, %v4277_v14  ;;  %v2183_v44 = vmul.f32 %v2635_v10, %v4278_v7  ;;  %v2188_v12 = vmul.f32 %v2635_v10, %v4279_v4 }
 0x188   : > { %v2219_v17 = vmul.f32 %v2206_v48, %v2158_v49  ;;  %v2224_v6 = vmul.f32 %v2206_v48, %v2163_v5  ;;  %v2229_v63 = vmul.f32 %v2206_v48, %v2168_v29  ;;  %v2234_v20 = vmul.f32 %v2206_v48, %v2173_v32  ;;  %v4280_v49 = vld [vmem:[#allocation8_spill] sm:$0xff] }
 0x189   : > { %v1966_v8 = vadd.f32 %v1965_v45, %v1964_v37  ;;  %v2239_v50 = vmul.f32 %v2206_v48, %v2178_v57  ;;  %v2244_v38 = vmul.f32 %v2206_v48, %v2183_v44  ;;  %v2249_v22 = vmul.f32 %v2206_v48, %v2188_v12 }
 0x18a   : > { %v2280_v55 = vadd.f32 %v2267_v51, %v2219_v17  ;;  %v2285_v2 = vadd.f32 %v2267_v51, %v2224_v6  ;;  %v2290_v47 = vadd.f32 %v2267_v51, %v2229_v63  ;;  %v2295_v36 = vadd.f32 %v2267_v51, %v2234_v20 }
 0x18b   : > { %v1972_v56 = vmul.f32 0.020408163, %v1966_v8  ;;  %v2300_v60 = vadd.f32 %v2267_v51, %v2239_v50  ;;  %v2305_v39 = vadd.f32 %v2267_v51, %v2244_v38  ;;  %v2310_v13 = vadd.f32 %v2267_v51, %v2249_v22 }
 0x18c   : > { %2315 = vst [vmem:[%s3514_s16 + $0x18] sm:$0x7f] %v2280_v55  ;;  %2320 = vst [vmem:[%s3514_s16 + $0x40] sm:$0x7f] %v2285_v2  ;;  %v2210_v45 = vrot.slane %v4274_v21, %v4280_v49  ;;  %v2271_v29 = vrot.slane %v4276_v59, %v4280_v49 }
 0x18d   : > { %v1977_v26 = vsub.f32 %v3946_v1, %v1972_v56  ;;  %v1982_v58 = vsub.f32 %v3948_v18, %v1972_v56  ;;  %v1987_v52 = vsub.f32 %v3950_v11, %v1972_v56  ;;  %v1992_v61 = vsub.f32 %v3952_v54, %v1972_v56  ;;  %2325 = vst [vmem:[%s3514_s16 + $0x68] sm:$0x7f] %v2290_v47 }
 0x18e   : > { %v1997_v41 = vsub.f32 %v3954_v40, %v1972_v56  ;;  %v2002_v31 = vsub.f32 %v3956_v30, %v1972_v56  ;;  %v2007_v19 = vsub.f32 %v3958_v23, %v1972_v56  ;;  %2330 = vst [vmem:[%s3514_s16 + $0x90] sm:$0x7f] %v2295_v36  ;;  %2335 = vst [vmem:[%s3514_s16 + $0xb8] sm:$0x7f] %v2300_v60  ;;  %v2369_v36 = vld [vmem:[%s3514_s16] sm:$0xff] (%p2734_p5)  ;;  %v2371_v60 = vld [vmem:[%s3514_s16 + $0x8] sm:$0xff] (%p2734_p5) }
 0x18f   : > { %2340 = vst [vmem:[%s3514_s16 + $0xe0] sm:$0x7f] %v2305_v39  ;;  %2345 = vst [vmem:[%s3514_s16 + $0x108] sm:$0x7f] %v2310_v13  ;;  %v2012_v16 = vmul.f32 %v1977_v26, %v1977_v26  ;;  %v2017_v1 = vmul.f32 %v1982_v58, %v1982_v58  ;;  %v2022_v43 = vmul.f32 %v1987_v52, %v1987_v52  ;;  %v2373_v39 = vld [vmem:[%s3514_s16 + $0x10] sm:$0xff] (%p2734_p5) }
 0x190   : > { %v2027_v18 = vmul.f32 %v1992_v61, %v1992_v61  ;;  %v2032_v33 = vmul.f32 %v1997_v41, %v1997_v41  ;;  %v2037_v62 = vmul.f32 %v2002_v31, %v2002_v31  ;;  %v2042_v0 = vmul.f32 %v2007_v19, %v2007_v19  ;;  %2370 = vst [vmem:[%s4113_s29] sm:$0xff] (%p2734_p5), %v2369_v36 }
 0x191   : > { %v2119_v11 = vsel %vm1871_vm0, %v2012_v16, 0.0  ;;  %v2120_v54 = vsel %vm1871_vm0, %v2017_v1, 0.0  ;;  %v2122_v24 = vsel %vm1871_vm0, %v2022_v43, 0.0  ;;  %2372 = vst [vmem:[%s4113_s29 + $0x8] sm:$0xff] (%p2734_p5), %v2371_v60  ;;  %2374 = vst [vmem:[%s4113_s29 + $0x10] sm:$0xff] (%p2734_p5), %v2373_v39  ;;  %v2391_v16 = vld [vmem:[%s3514_s16 + $0x58] sm:$0xff] (%p2734_p5) }
 0x192   : > { %v2121_v40 = vadd.f32 %v2120_v54, %v2119_v11  ;;  %v2124_v30 = vsel %vm1871_vm0, %v2027_v18, 0.0  ;;  %v2126_v9 = vsel %vm1871_vm0, %v2032_v33, 0.0  ;;  %v2128_v35 = vsel %vm1871_vm0, %v2037_v62, 0.0  ;;  %2392 = vst [vmem:[%s4113_s29 + $0xf8] sm:$0xff] (%p2734_p5), %v2391_v16  ;;  %v2393_v1 = vld [vmem:[%s3514_s16 + $0x60] sm:$0xff] (%p2734_p5)  ;;  %v2399_v33 = vld [vmem:[%s3514_s16 + $0x78] sm:$0xff] (%p2734_p5) }
 0x193   : > { %v2130_v25 = vsel %vm1871_vm0, %v2042_v0, 0.0  ;;  %v2375_v13 = vld [vmem:[%s3514_s16 + $0x18] sm:$0xff] (%p2734_p5)  ;;  %2394 = vst [vmem:[%s4113_s29 + $0x100] sm:$0xff] (%p2734_p5), %v2393_v1  ;;  %v2401_v11 = vld [vmem:[%s3514_s16 + $0x80] sm:$0xff] (%p2734_p5)  ;;  %v2403_v54 = vld [vmem:[%s3514_s16 + $0x88] sm:$0xff] (%p2734_p5) }
 0x194   : > { %v2123_v23 = vadd.f32 %v2122_v24, %v2121_v40  ;;  %2376 = vst [vmem:[%s4113_s29 + $0x18] sm:$0xff] (%p2734_p5), %v2375_v13  ;;  %v2395_v43 = vld [vmem:[%s3514_s16 + $0x68] sm:$0xff] (%p2734_p5)  ;;  %2400 = vst [vmem:[%s4113_s29 + $0x168] sm:$0xff] (%p2734_p5), %v2399_v33  ;;  %v2409_v62 = vld [vmem:[%s3514_s16 + $0xa0] sm:$0xff] (%p2734_p5) }
 0x195   : > { %2396 = vst [vmem:[%s4113_s29 + $0x108] sm:$0xff] (%p2734_p5), %v2395_v43  ;;  %2402 = vst [vmem:[%s4113_s29 + $0x170] sm:$0xff] (%p2734_p5), %v2401_v11  ;;  %v2405_v24 = vld [vmem:[%s3514_s16 + $0x90] sm:$0xff] (%p2734_p5)  ;;  %v2415_v0 = vld [vmem:[%s3514_s16 + $0xb8] sm:$0xff] (%p2734_p5) }
 0x196   : > { %v2125_v34 = vadd.f32 %v2124_v30, %v2123_v23  ;;  %2404 = vst [vmem:[%s4113_s29 + $0x178] sm:$0xff] (%p2734_p5), %v2403_v54  ;;  %2406 = vst [vmem:[%s4113_s29 + $0x180] sm:$0xff] (%p2734_p5), %v2405_v24  ;;  %v2411_v30 = vld [vmem:[%s3514_s16 + $0xa8] sm:$0xff] (%p2734_p5)  ;;  %v2413_v23 = vld [vmem:[%s3514_s16 + $0xb0] sm:$0xff] (%p2734_p5) }
 0x197   : > { %2410 = vst [vmem:[%s4113_s29 + $0x1e0] sm:$0xff] (%p2734_p5), %v2409_v62  ;;  %2412 = vst [vmem:[%s4113_s29 + $0x1e8] sm:$0xff] (%p2734_p5), %v2411_v30 }
 0x198   : > { %v2127_v46 = vadd.f32 %v2126_v9, %v2125_v34  ;;  %2414 = vst [vmem:[%s4113_s29 + $0x1f0] sm:$0xff] (%p2734_p5), %v2413_v23  ;;  %2416 = vst [vmem:[%s4113_s29 + $0x1f8] sm:$0xff] (%p2734_p5), %v2415_v0  ;;  %v2419_v34 = vld [vmem:[%s3514_s16 + $0xc8] sm:$0xff] (%p2734_p5) }
 0x199   : > { %2420 = vst [vmem:[%s4113_s29 + $0x258] sm:$0xff] (%p2734_p5), %v2419_v34 }
 0x19a   : > { %v2129_v42 = vadd.f32 %v2128_v35, %v2127_v46  ;;  %v2421_v35 = vld [vmem:[%s3514_s16 + $0xd0] sm:$0xff] (%p2734_p5)  ;;  %v2423_v46 = vld [vmem:[%s3514_s16 + $0xd8] sm:$0xff] (%p2734_p5) }
 0x19b   : > { %2422 = vst [vmem:[%s4113_s29 + $0x260] sm:$0xff] (%p2734_p5), %v2421_v35  ;;  %2424 = vst [vmem:[%s4113_s29 + $0x268] sm:$0xff] (%p2734_p5), %v2423_v46 }
 0x19c   : > { %v2131_v15 = vadd.f32 %v2130_v25, %v2129_v42  ;;  %v2425_v25 = vld [vmem:[%s3514_s16 + $0xe0] sm:$0xff] (%p2734_p5) }
 0x19d   : > { %2426 = vst [vmem:[%s4113_s29 + $0x270] sm:$0xff] (%p2734_p5), %v2425_v25 }
 0x19e   : > { %v2132_v3 = vrot.slane %v2131_v15, 4 }
 0x1a0   : > { %v2133_v53 = vadd.f32 %v2132_v3, %v2131_v15  ;;  %v2429_v15 = vld [vmem:[%s3514_s16 + $0xf0] sm:$0xff] (%p2734_p5)  ;;  %v2431_v3 = vld [vmem:[%s3514_s16 + $0xf8] sm:$0xff] (%p2734_p5) }
 0x1a1   : > { %2430 = vst [vmem:[%s4113_s29 + $0x2d0] sm:$0xff] (%p2734_p5), %v2429_v15  ;;  %2432 = vst [vmem:[%s4113_s29 + $0x2d8] sm:$0xff] (%p2734_p5), %v2431_v3 }
 0x1a2   : > { %v2134_v48 = vrot.slane %v2133_v53, 2 }
 0x1a4   : > { %v2135_v37 = vadd.f32 %v2134_v48, %v2133_v53  ;;  %v2433_v53 = vld [vmem:[%s3514_s16 + $0x100] sm:$0xff] (%p2734_p5)  ;;  %v2435_v48 = vld [vmem:[%s3514_s16 + $0x108] sm:$0xff] (%p2734_p5) }
 0x1a5   : > { %2434 = vst [vmem:[%s4113_s29 + $0x2e0] sm:$0xff] (%p2734_p5), %v2433_v53  ;;  %2436 = vst [vmem:[%s4113_s29 + $0x2e8] sm:$0xff] (%p2734_p5), %v2435_v48 }
 0x1a6   : > { %v2136_v27 = vrot.slane %v2135_v37, 1 }
 0x1a8   : > { %v2137_v10 = vadd.f32 %v2136_v27, %v2135_v37 }
 0x1aa   : > { %v2142_v28 = vmul.f32 0.020408163, %v2137_v10 }
 0x1ac   : > { %v2147_v51 = vadd.f32 0.001, %v2142_v28 }
 0x1ae   : > { %2636 = vrsqrt.f32 %v2147_v51 }
 0x1b8   : > { %v2637_v5 = vpop.eup %2636 }
 0x1b9   : > { %v2159_v32 = vmul.f32 %v2637_v5, %v1977_v26  ;;  %v2164_v14 = vmul.f32 %v2637_v5, %v1982_v58  ;;  %v2169_v57 = vmul.f32 %v2637_v5, %v1987_v52  ;;  %v2174_v7 = vmul.f32 %v2637_v5, %v1992_v61  ;;  %v2379_v58 = vld [vmem:[%s3514_s16 + $0x28] sm:$0xff] (%p2734_p5)  ;;  %v2381_v52 = vld [vmem:[%s3514_s16 + $0x30] sm:$0xff] (%p2734_p5)  ;;  %v2383_v61 = vld [vmem:[%s3514_s16 + $0x38] sm:$0xff] (%p2734_p5) }
 0x1ba   : > { %v2179_v44 = vmul.f32 %v2637_v5, %v1997_v41  ;;  %v2184_v4 = vmul.f32 %v2637_v5, %v2002_v31  ;;  %v2189_v12 = vmul.f32 %v2637_v5, %v2007_v19  ;;  %v2385_v41 = vld [vmem:[%s3514_s16 + $0x40] sm:$0xff] (%p2734_p5)  ;;  %2380 = vst [vmem:[%s4113_s29 + $0x78] sm:$0xff] (%p2734_p5), %v2379_v58  ;;  %2382 = vst [vmem:[%s4113_s29 + $0x80] sm:$0xff] (%p2734_p5), %v2381_v52  ;;  %v2389_v19 = vld [vmem:[%s3514_s16 + $0x50] sm:$0xff] (%p2734_p5) }
 0x1bb   : > { %v2220_v17 = vmul.f32 %v2210_v45, %v2159_v32  ;;  %v2225_v8 = vmul.f32 %v2210_v45, %v2164_v14  ;;  %v2230_v6 = vmul.f32 %v2210_v45, %v2169_v57  ;;  %v2235_v21 = vmul.f32 %v2210_v45, %v2174_v7  ;;  %2384 = vst [vmem:[%s4113_s29 + $0x88] sm:$0xff] (%p2734_p5), %v2383_v61 }
 0x1bc   : > { %v2240_v63 = vmul.f32 %v2210_v45, %v2179_v44  ;;  %v2245_v59 = vmul.f32 %v2210_v45, %v2184_v4  ;;  %v2250_v20 = vmul.f32 %v2210_v45, %v2189_v12  ;;  %2353 = sbr.rel (!%p2734_p5) target bundleno = 459 (0x1cb), region = 143  ;;  %2386 = vst [vmem:[%s4113_s29 + $0x90] sm:$0xff] (%p2734_p5), %v2385_v41  ;;  %2390 = vst [vmem:[%s4113_s29 + $0xf0] sm:$0xff] (%p2734_p5), %v2389_v19 }
 0x1bd   : > { %v2281_v50 = vadd.f32 %v2271_v29, %v2220_v17  ;;  %v2286_v38 = vadd.f32 %v2271_v29, %v2225_v8  ;;  %v2291_v22 = vadd.f32 %v2271_v29, %v2230_v6  ;;  %v2296_v55 = vadd.f32 %v2271_v29, %v2235_v21 }
 0x1be   : > { %v2301_v56 = vadd.f32 %v2271_v29, %v2240_v63  ;;  %v2306_v2 = vadd.f32 %v2271_v29, %v2245_v59  ;;  %v2311_v47 = vadd.f32 %v2271_v29, %v2250_v20 }
 0x1bf   : > { %2316 = vst [vmem:[%s3514_s16 + $0x20] sm:$0x7f] %v2281_v50  ;;  %2321 = vst [vmem:[%s3514_s16 + $0x48] sm:$0x7f] %v2286_v38 }
 0x1c0   : > { %2326 = vst [vmem:[%s3514_s16 + $0x70] sm:$0x7f] %v2291_v22  ;;  %2331 = vst [vmem:[%s3514_s16 + $0x98] sm:$0x7f] %v2296_v55 }
 0x1c1   : > { %2336 = vst [vmem:[%s3514_s16 + $0xc0] sm:$0x7f] %v2301_v56  ;;  %2341 = vst [vmem:[%s3514_s16 + $0xe8] sm:$0x7f] %v2306_v2 }
 0x1c2   : > { %2346 = vst [vmem:[%s3514_s16 + $0x110] sm:$0x7f] %v2311_v47 }
 0x1c6   : > { %v2377_v26 = vld [vmem:[%s3514_s16 + $0x20] sm:$0xff]  ;;  %v2387_v31 = vld [vmem:[%s3514_s16 + $0x48] sm:$0xff] }
 0x1c7   : > { %2378 = vst [vmem:[%s4113_s29 + $0x20] sm:$0xff] %v2377_v26  ;;  %2388 = vst [vmem:[%s4113_s29 + $0x98] sm:$0xff] %v2387_v31  ;;  %v2397_v18 = vld [vmem:[%s3514_s16 + $0x70] sm:$0xff]  ;;  %v2407_v40 = vld [vmem:[%s3514_s16 + $0x98] sm:$0xff] }
 0x1c8   : > { %2398 = vst [vmem:[%s4113_s29 + $0x110] sm:$0xff] %v2397_v18  ;;  %2408 = vst [vmem:[%s4113_s29 + $0x188] sm:$0xff] %v2407_v40  ;;  %v2417_v9 = vld [vmem:[%s3514_s16 + $0xc0] sm:$0xff]  ;;  %v2427_v42 = vld [vmem:[%s3514_s16 + $0xe8] sm:$0xff] }
 0x1c9   : > { %2418 = vst [vmem:[%s4113_s29 + $0x200] sm:$0xff] %v2417_v9  ;;  %2428 = vst [vmem:[%s4113_s29 + $0x278] sm:$0xff] %v2427_v42  ;;  %v2437_v37 = vld [vmem:[%s3514_s16 + $0x110] sm:$0xff] }
 0x1ca   : > { %2438 = vst [vmem:[%s4113_s29 + $0x2f0] sm:$0xff] %v2437_v37 }
 0x1cb PF: > { %p13_p11 = scmp.ge.s32.totalorder %s2718_s25, 5   ;;  %s4281_s21 = smov %s2658_s22 }
 0x1cc   : > { %s4282_s22 = smov %s2728_s28  ;;  %s4283_s23 = smov %s2718_s25 }
 0x1cd   :  { %15 = sbr.rel (!%p13_p11) target bundleno = 2 (0x2), region = 233 }

</bundles_post_ra>
